<compile_context>
chip_gen: v6e
topology: v6e:2x2x1
jax: 0.10.0
libtpu: 0.0.40
codegen_flags: <defaults>
</compile_context>

<pallas_src>
import functools
import numpy as np
import jax
import jax.numpy as jnp
from jax.experimental import pallas as pl
from jax.experimental.pallas import tpu as pltpu


# ------------------------------ small helpers -------------------------------

_VMEM_LIMIT = 48 * 1024 * 1024   # > default scoped limit everywhere, < v7x physical


def _round_up(x, m):
    return (x + m - 1) // m * m


def _row_tiling(m, target=512):
    """Return (row_tile, padded_rows); tile is a multiple of 8 dividing padded_rows."""
    # TODO(synk): re-derive `target` per generation (v7x has 64 MiB VMEM).
    tm = min(target, _round_up(m, 8))
    return tm, _round_up(m, tm)


def _pick_lane_tile(n, target=2048):
    """Largest multiple-of-128 tile <= target dividing n (or n itself)."""
    if n <= target:
        return n
    t = (target // 128) * 128
    while t >= 128:
        if n % t == 0:
            return t
        t -= 128
    # TODO(synk): pad + in-kernel column masking for ragged vocab sizes.
    return n


def _pad_rows(x, m_pad):
    if x.shape[0] == m_pad:
        return x
    return jnp.pad(x, ((0, m_pad - x.shape[0]), (0, 0)))


def _cparams(*sem):
    return pltpu.CompilerParams(dimension_semantics=sem,
                                vmem_limit_bytes=_VMEM_LIMIT)


def _const_spec(shape):
    """Constant-index (weight/bias/LN) block: VMEM-resident across the grid and,
    where supported, single-buffered (no pointless double-buffer of weights)."""
    index_map = lambda i: (0, 0)
    try:
        return pl.BlockSpec(shape, index_map, pipeline_mode=pl.Buffered(1))
    except Exception:  # older jax without pipeline_mode / Buffered
        return pl.BlockSpec(shape, index_map)


# ----------------------------- Pallas kernels ------------------------------

def _linear_kernel(x_ref, w_ref, b_ref, o_ref):
    x = x_ref[...].astype(jnp.bfloat16)          # activations cast per-tile (cheap)
    o_ref[...] = (jnp.dot(x, w_ref[...], preferred_element_type=jnp.float32)
                  + b_ref[...])


def linear(x2d, w_bf16, b):
    """[M, K] @ [K, N] + b, row-tiled; bf16 weight resident across the grid."""
    M, K = x2d.shape
    N = w_bf16.shape[1]
    TM, Mp = _row_tiling(M)
    xp = _pad_rows(x2d, Mp)
    out = pl.pallas_call(
        _linear_kernel,
        out_shape=jax.ShapeDtypeStruct((Mp, N), jnp.float32),
        grid=(Mp // TM,),
        in_specs=[pl.BlockSpec((TM, K), lambda i: (i, 0)),
                  _const_spec((K, N)),
                  _const_spec((1, N))],
        out_specs=pl.BlockSpec((TM, N), lambda i: (i, 0)),
        compiler_params=_cparams("parallel"),
    )(xp, w_bf16, b.reshape(1, N))
    return out[:M] if Mp != M else out


def _proj_residual_ln_kernel(x_ref, w_ref, b_ref, r_ref, g_ref, bb_ref,
                             o_ref, *, eps):
    # out-projection + residual add + post-LayerNorm, fused.
    x = x_ref[...].astype(jnp.bfloat16)
    y = (jnp.dot(x, w_ref[...], preferred_element_type=jnp.float32)
         + b_ref[...] + r_ref[...])
    mu = jnp.mean(y, axis=-1, keepdims=True)
    var = jnp.mean(jnp.square(y - mu), axis=-1, keepdims=True)
    o_ref[...] = (y - mu) * jax.lax.rsqrt(var + eps) * g_ref[...] + bb_ref[...]


def proj_residual_ln(x2d, w_bf16, b, res2d, gamma, beta, eps=1e-5):
    M, K = x2d.shape
    N = w_bf16.shape[1]
    TM, Mp = _row_tiling(M)
    xp = _pad_rows(x2d, Mp)
    rp = _pad_rows(res2d, Mp)
    kernel = functools.partial(_proj_residual_ln_kernel, eps=eps)
    out = pl.pallas_call(
        kernel,
        out_shape=jax.ShapeDtypeStruct((Mp, N), jnp.float32),
        grid=(Mp // TM,),
        in_specs=[pl.BlockSpec((TM, K), lambda i: (i, 0)),
                  _const_spec((K, N)),
                  _const_spec((1, N)),
                  pl.BlockSpec((TM, N), lambda i: (i, 0)),
                  _const_spec((1, N)),
                  _const_spec((1, N))],
        out_specs=pl.BlockSpec((TM, N), lambda i: (i, 0)),
        compiler_params=_cparams("parallel"),
    )(xp, w_bf16, b.reshape(1, N), rp, gamma.reshape(1, N), beta.reshape(1, N))
    return out[:M] if Mp != M else out


def _ffn_ln_kernel(x_ref, w1_ref, b1_ref, w2_ref, b2_ref, g_ref, bb_ref,
                   o_ref, *, eps):
    # Linear -> ReLU -> Linear -> +residual -> LayerNorm, fused.
    x_f32 = x_ref[...]
    x = x_f32.astype(jnp.bfloat16)
    h = jnp.dot(x, w1_ref[...], preferred_element_type=jnp.float32) + b1_ref[...]
    h = jnp.maximum(h, 0.0)
    y = (jnp.dot(h.astype(jnp.bfloat16), w2_ref[...],
                 preferred_element_type=jnp.float32)
         + b2_ref[...] + x_f32)                       # post-LN residual
    mu = jnp.mean(y, axis=-1, keepdims=True)
    var = jnp.mean(jnp.square(y - mu), axis=-1, keepdims=True)
    o_ref[...] = (y - mu) * jax.lax.rsqrt(var + eps) * g_ref[...] + bb_ref[...]


def ffn_residual_ln(x2d, w1_bf16, b1, w2_bf16, b2, gamma, beta, eps=1e-5):
    M, D = x2d.shape
    F = w1_bf16.shape[1]
    TM, Mp = _row_tiling(M)
    xp = _pad_rows(x2d, Mp)
    kernel = functools.partial(_ffn_ln_kernel, eps=eps)
    out = pl.pallas_call(
        kernel,
        out_shape=jax.ShapeDtypeStruct((Mp, D), jnp.float32),
        grid=(Mp // TM,),
        in_specs=[pl.BlockSpec((TM, D), lambda i: (i, 0)),
                  _const_spec((D, F)),
                  _const_spec((1, F)),
                  _const_spec((F, D)),
                  _const_spec((1, D)),
                  _const_spec((1, D)),
                  _const_spec((1, D))],
        out_specs=pl.BlockSpec((TM, D), lambda i: (i, 0)),
        compiler_params=_cparams("parallel"),
    )(xp, w1_bf16, b1.reshape(1, F), w2_bf16, b2.reshape(1, D),
      gamma.reshape(1, D), beta.reshape(1, D))
    return out[:M] if Mp != M else out


def _attn_kernel(q_ref, k_ref, v_ref, kpad_ref, ctx_ref, *attn_refs,
                 scale, num_heads, causal):
    """Per-batch attention; heads are an unrolled in-kernel loop.

    Mask = key-padding vector (passed, [1, Lk]) OR in-kernel causal iota mask.
    Context is written as a single lane-dense [Lq, D] block.
    """
    attn_ref = attn_refs[0] if attn_refs else None
    Lq, D = q_ref.shape[1], q_ref.shape[2]
    Lk = k_ref.shape[1]
    Dh = D // num_heads

    q_all = q_ref[0].astype(jnp.bfloat16)        # [Lq, D]
    k_all = k_ref[0].astype(jnp.bfloat16)        # [Lk, D]
    v_all = v_ref[0].astype(jnp.bfloat16)        # [Lk, D]

    masked = kpad_ref[0] > 0                     # [1, Lk] key padding
    if causal:
        row = jax.lax.broadcasted_iota(jnp.int32, (Lq, Lk), 0)
        col = jax.lax.broadcasted_iota(jnp.int32, (Lq, Lk), 1)
        masked = jnp.logical_or(masked, col > row)   # [Lq, Lk]

    ctx_heads = []
    for h in range(num_heads):                   # static unroll over heads
        q = jax.lax.slice_in_dim(q_all, h * Dh, (h + 1) * Dh, axis=1)
        k = jax.lax.slice_in_dim(k_all, h * Dh, (h + 1) * Dh, axis=1)
        v = jax.lax.slice_in_dim(v_all, h * Dh, (h + 1) * Dh, axis=1)
        s = jax.lax.dot_general(q, k, (((1,), (1,)), ((), ())),
                                preferred_element_type=jnp.float32) * scale
        # -1e30 (not -inf) so fully-masked rows stay finite (no 0/0 NaN).
        s = jnp.where(masked, -1e30, s)
        m = jnp.max(s, axis=-1, keepdims=True)
        p = jnp.exp(s - m)
        attn = p / jnp.sum(p, axis=-1, keepdims=True)
        if attn_ref is not None:
            attn_ref[0, h] = attn
        ctx_heads.append(jnp.dot(attn.astype(jnp.bfloat16), v,
                                 preferred_element_type=jnp.float32))
    ctx_ref[0] = jnp.concatenate(ctx_heads, axis=-1)   # lane-dense [Lq, D] store


def scaled_dot_product_attention(q, k, v, key_pad, scale, num_heads, causal,
                                 return_attn=True):
    """q: [B, Lq, D]; k,v: [B, Lk, D]; key_pad: [B, 1, Lk] int32 (1 == pad key)."""
    B, Lq, D = q.shape
    Lk = k.shape[1]
    kernel = functools.partial(_attn_kernel, scale=scale, num_heads=num_heads,
                               causal=causal)
    out_shape = [jax.ShapeDtypeStruct((B, Lq, D), jnp.float32)]
    out_specs = [pl.BlockSpec((1, Lq, D), lambda b: (b, 0, 0))]
    if return_attn:
        # TODO(synk): drop this output + stream KV (flash-style) at production L.
        out_shape.append(jax.ShapeDtypeStruct((B, num_heads, Lq, Lk), jnp.float32))
        out_specs.append(pl.BlockSpec((1, num_heads, Lq, Lk),
                                      lambda b: (b, 0, 0, 0)))
    outs = pl.pallas_call(
        kernel,
        out_shape=tuple(out_shape),
        grid=(B,),
        in_specs=[pl.BlockSpec((1, Lq, D), lambda b: (b, 0, 0)),
                  pl.BlockSpec((1, Lk, D), lambda b: (b, 0, 0)),
                  pl.BlockSpec((1, Lk, D), lambda b: (b, 0, 0)),
                  pl.BlockSpec((1, 1, Lk), lambda b: (b, 0, 0))],
        out_specs=tuple(out_specs),
        compiler_params=_cparams("parallel"),
    )(q, k, v, key_pad)
    if return_attn:
        return outs[0], outs[1]
    return outs[0], None


def _linear_softmax_kernel(x_ref, w_ref, o_ref, m_ref, l_ref):
    """Vocab-tiled projection + two-pass online softmax.

    Grid = (row_tiles, 2 passes, vocab_tiles).  Pass 0 streams vocab tiles and
    accumulates the running max / exp-sum in VMEM scratch; pass 1 recomputes
    the logits tile and writes the normalized probabilities.
    """
    phase = pl.program_id(1)
    j = pl.program_id(2)

    @pl.when(jnp.logical_and(phase == 0, j == 0))
    def _():
        m_ref[...] = jnp.full(m_ref.shape, -jnp.inf, dtype=jnp.float32)
        l_ref[...] = jnp.zeros(l_ref.shape, dtype=jnp.float32)

    logits = jnp.dot(x_ref[...].astype(jnp.bfloat16), w_ref[...],
                     preferred_element_type=jnp.float32)

    @pl.when(phase == 0)
    def _():
        m_prev = m_ref[...]
        m_new = jnp.maximum(m_prev, jnp.max(logits, axis=-1, keepdims=True))
        l_ref[...] = (l_ref[...] * jnp.exp(m_prev - m_new)
                      + jnp.sum(jnp.exp(logits - m_new), axis=-1, keepdims=True))
        m_ref[...] = m_new

    @pl.when(phase == 1)
    def _():
        o_ref[...] = jnp.exp(logits - m_ref[...]) / l_ref[...]


def linear_softmax(x2d, w_bf16):
    M, D = x2d.shape
    V = w_bf16.shape[1]
    TM, Mp = _row_tiling(M)
    TV = _pick_lane_tile(V)
    nV = V // TV
    xp = _pad_rows(x2d, Mp)
    out = pl.pallas_call(
        _linear_softmax_kernel,
        out_shape=jax.ShapeDtypeStruct((Mp, V), jnp.float32),
        grid=(Mp // TM, 2, nV),
        in_specs=[pl.BlockSpec((TM, D), lambda i, p, j: (i, 0)),
                  pl.BlockSpec((D, TV), lambda i, p, j: (0, j))],
        # pass 0 parks on block (i, 0) (no writeback happens until a real
        # write in pass 1 changes the data); pass 1 writes each (i, j) once.
        out_specs=pl.BlockSpec((TM, TV), lambda i, p, j: (i, j * p)),
        scratch_shapes=[pltpu.VMEM((TM, 1), jnp.float32),
                        pltpu.VMEM((TM, 1), jnp.float32)],
        compiler_params=_cparams("parallel", "arbitrary", "arbitrary"),
    )(xp, w_bf16)
    return out[:M] if Mp != M else out


# ------------------------------ model (glue) -------------------------------

def sinusoid_table(max_len, d):
    pos = np.arange(max_len)[:, None]
    j = np.arange(d)[None, :]
    angle = pos / np.power(10000.0, 2.0 * (j // 2) / d)
    table = np.zeros((max_len, d), np.float32)
    table[:, 0::2] = np.sin(angle[:, 0::2])
    table[:, 1::2] = np.cos(angle[:, 1::2])
    return jnp.asarray(np.concatenate([np.zeros((1, d), np.float32), table], 0))


def positional_encoding(pos_table, lengths, seq_len):
    pos = jnp.arange(1, seq_len + 1)[None, :]
    pos = jnp.where(pos <= lengths[:, None], pos, 0)   # 0 row == padding pos
    return pos_table[pos]


def self_attention_block(p, x, key_pad, causal, num_heads):
    B, L, D = x.shape
    x2 = x.reshape(B * L, D)
    # fused QKV projection (weights pre-concatenated + bf16 in prepare_params)
    qkv = linear(x2, p['wqkv'], p['bqkv'])             # [B*L, 3D]
    q = qkv[:, :D].reshape(B, L, D)
    k = qkv[:, D:2 * D].reshape(B, L, D)
    v = qkv[:, 2 * D:].reshape(B, L, D)
    scale = 1.0 / float(np.sqrt(D // num_heads))
    ctx, attn = scaled_dot_product_attention(q, k, v, key_pad, scale,
                                             num_heads, causal)
    out = proj_residual_ln(ctx.reshape(B * L, D), p['wo'], p['bo'], x2,
                           p['ln_g'], p['ln_b'])
    return out.reshape(B, L, D), attn.reshape(B * num_heads, L, L)


def cross_attention_block(p, x, memory, key_pad, num_heads):
    B, Lq, D = x.shape
    Lk = memory.shape[1]
    x2 = x.reshape(B * Lq, D)
    m2 = memory.reshape(B * Lk, D)
    q = linear(x2, p['wq'], p['bq']).reshape(B, Lq, D)
    kv = linear(m2, p['wkv'], p['bkv'])                # fused KV projection
    k = kv[:, :D].reshape(B, Lk, D)
    v = kv[:, D:].reshape(B, Lk, D)
    scale = 1.0 / float(np.sqrt(D // num_heads))
    ctx, attn = scaled_dot_product_attention(q, k, v, key_pad, scale,
                                             num_heads, False)
    out = proj_residual_ln(ctx.reshape(B * Lq, D), p['wo'], p['bo'], x2,
                           p['ln_g'], p['ln_b'])
    return out.reshape(B, Lq, D), attn.reshape(B * num_heads, Lq, Lk)


def feed_forward(p, x):
    B, L, D = x.shape
    out = ffn_residual_ln(x.reshape(B * L, D), p['w1'], p['b1'],
                          p['w2'], p['b2'], p['ln_g'], p['ln_b'])
    return out.reshape(B, L, D)


def encoder_forward(p, src_seq, src_len, src_key_pad, num_heads):
    B, L = src_seq.shape
    x = p['emb'][src_seq] + positional_encoding(p['pos'], src_len, L)
    attns = []
    for lp in p['layers']:
        x, a = self_attention_block(lp['attn'], x, src_key_pad, False, num_heads)
        x = feed_forward(lp['ffn'], x)
        attns.append(a)
    return x, attns


def decoder_forward(p, tgt_seq, tgt_len, enc_out, src_key_pad, tgt_key_pad,
                    num_heads):
    B, L = tgt_seq.shape
    x = p['emb'][tgt_seq] + positional_encoding(p['pos'], tgt_len, L)
    self_attns, ctx_attns = [], []
    for lp in p['layers']:
        x, sa = self_attention_block(lp['self_attn'], x, tgt_key_pad, True,
                                     num_heads)
        x, ca = cross_attention_block(lp['ctx_attn'], x, enc_out, src_key_pad,
                                      num_heads)
        x = feed_forward(lp['ffn'], x)
        self_attns.append(sa)
        ctx_attns.append(ca)
    return x, self_attns, ctx_attns


def transformer_forward(params, src_seq, src_len, tgt_seq, tgt_len, num_heads):
    # key-padding vectors (token id 0 == pad) -- replaces the O(L^2) f32 masks.
    src_key_pad = (src_seq == 0).astype(jnp.int32)[:, None, :]   # [B, 1, Ls]
    tgt_key_pad = (tgt_seq == 0).astype(jnp.int32)[:, None, :]   # [B, 1, Lt]

    enc_out, enc_attn = encoder_forward(params['encoder'], src_seq, src_len,
                                        src_key_pad, num_heads)
    dec_out, dec_attn, ctx_attn = decoder_forward(
        params['decoder'], tgt_seq, tgt_len, enc_out, src_key_pad, tgt_key_pad,
        num_heads)
    B, L, D = dec_out.shape
    out = linear_softmax(dec_out.reshape(B * L, D), params['final_w'])
    return out.reshape(B, L, -1), enc_attn, dec_attn, ctx_attn


# ------------------------------- parameters --------------------------------

def init_params(key, src_vocab, src_max_len, tgt_vocab, tgt_max_len,
                num_layers, model_dim, num_heads, ffn_dim):
    """PyTorch-layout f32 parameters (separate Wq/Wk/Wv, etc.)."""
    keyit = iter(jax.random.split(key, 1024))

    def normal(shape, scale=0.02):
        return jax.random.normal(next(keyit), shape, jnp.float32) * scale

    def mha_params():
        return dict(
            wq=normal((model_dim, model_dim)), bq=jnp.zeros((model_dim,), jnp.float32),
            wk=normal((model_dim, model_dim)), bk=jnp.zeros((model_dim,), jnp.float32),
            wv=normal((model_dim, model_dim)), bv=jnp.zeros((model_dim,), jnp.float32),
            wo=normal((model_dim, model_dim)), bo=jnp.zeros((model_dim,), jnp.float32),
            ln_g=jnp.ones((model_dim,), jnp.float32),
            ln_b=jnp.zeros((model_dim,), jnp.float32))

    def ffn_params():
        return dict(
            w1=normal((model_dim, ffn_dim)), b1=jnp.zeros((ffn_dim,), jnp.float32),
            w2=normal((ffn_dim, model_dim)), b2=jnp.zeros((model_dim,), jnp.float32),
            ln_g=jnp.ones((model_dim,), jnp.float32),
            ln_b=jnp.zeros((model_dim,), jnp.float32))

    def embedding(vocab):
        emb = normal((vocab + 1, model_dim), scale=1.0)
        return emb.at[0].set(0.0)   # padding_idx=0

    encoder = dict(
        emb=embedding(src_vocab),
        pos=sinusoid_table(src_max_len, model_dim),
        layers=[dict(attn=mha_params(), ffn=ffn_params()) for _ in range(num_layers)])
    decoder = dict(
        emb=embedding(tgt_vocab),
        pos=sinusoid_table(tgt_max_len, model_dim),
        layers=[dict(self_attn=mha_params(), ctx_attn=mha_params(), ffn=ffn_params())
                for _ in range(num_layers)])
    final_w = normal((model_dim, tgt_vocab))        # nn.Linear(model_dim, V, bias=False)
    return dict(encoder=encoder, decoder=decoder, final_w=final_w)


def prepare_params(params):
    """One-time: fuse QKV / KV weights and cast all matmul weights to bf16.
    Biases / LayerNorm params / embeddings stay f32."""
    def prep_self(p):
        return dict(
            wqkv=jnp.concatenate([p['wq'], p['wk'], p['wv']], 1).astype(jnp.bfloat16),
            bqkv=jnp.concatenate([p['bq'], p['bk'], p['bv']], 0),
            wo=p['wo'].astype(jnp.bfloat16), bo=p['bo'],
            ln_g=p['ln_g'], ln_b=p['ln_b'])

    def prep_cross(p):
        return dict(
            wq=p['wq'].astype(jnp.bfloat16), bq=p['bq'],
            wkv=jnp.concatenate([p['wk'], p['wv']], 1).astype(jnp.bfloat16),
            bkv=jnp.concatenate([p['bk'], p['bv']], 0),
            wo=p['wo'].astype(jnp.bfloat16), bo=p['bo'],
            ln_g=p['ln_g'], ln_b=p['ln_b'])

    def prep_ffn(p):
        return dict(w1=p['w1'].astype(jnp.bfloat16), b1=p['b1'],
                    w2=p['w2'].astype(jnp.bfloat16), b2=p['b2'],
                    ln_g=p['ln_g'], ln_b=p['ln_b'])

    enc, dec = params['encoder'], params['decoder']
    return dict(
        encoder=dict(emb=enc['emb'], pos=enc['pos'],
                     layers=[dict(attn=prep_self(l['attn']),
                                  ffn=prep_ffn(l['ffn'])) for l in enc['layers']]),
        decoder=dict(emb=dec['emb'], pos=dec['pos'],
                     layers=[dict(self_attn=prep_self(l['self_attn']),
                                  ctx_attn=prep_cross(l['ctx_attn']),
                                  ffn=prep_ffn(l['ffn'])) for l in dec['layers']]),
        final_w=params['final_w'].astype(jnp.bfloat16))


# ---------------------------------- main ------------------------------------

if __name__ == "__main__":
    B, L = 2, 8
    src_vocab, tgt_vocab = 16, 16
    src_max_len = tgt_max_len = 16
    num_layers, model_dim, num_heads, ffn_dim = 2, 32, 4, 64

    root = jax.random.PRNGKey(0)
    kp, ks, kt = jax.random.split(root, 3)
    raw_params = init_params(kp, src_vocab, src_max_len, tgt_vocab, tgt_max_len,
                             num_layers, model_dim, num_heads, ffn_dim)
    params = prepare_params(raw_params)   # fuse + cast weights ONCE

    src_len = jnp.array([8, 6], dtype=jnp.int32)
    tgt_len = jnp.array([8, 5], dtype=jnp.int32)
    src_seq = jax.random.randint(ks, (B, L), 1, src_vocab + 1, dtype=jnp.int32)
    tgt_seq = jax.random.randint(kt, (B, L), 1, tgt_vocab + 1, dtype=jnp.int32)
    pos = jnp.arange(L)[None, :]
    src_seq = jnp.where(pos < src_len[:, None], src_seq, 0)   # 0 == pad token
    tgt_seq = jnp.where(pos < tgt_len[:, None], tgt_seq, 0)

    fwd = jax.jit(functools.partial(transformer_forward, num_heads=num_heads))
    out, enc_attn, dec_attn, ctx_attn = fwd(params, src_seq, src_len, tgt_seq, tgt_len)
    jax.block_until_ready(out)

    assert out.shape == (B, L, tgt_vocab)
    assert bool(jnp.all(jnp.isfinite(out)))
    row_sums = jnp.sum(out, axis=-1)
    assert bool(jnp.all(jnp.abs(row_sums - 1.0) < 1e-3))   # softmax normalized
    assert len(enc_attn) == num_layers and len(dec_attn) == num_layers
    assert ctx_attn[0].shape == (B * num_heads, L, L)
    print("KERNEL_OK")
</pallas_src>

<mosaic_0001>
module attributes {stable_mosaic.version = 11 : i64} {
  func.func @_linear_kernel(%arg0: i32, %arg1: memref<16x32xf32, #tpu.memory_space<vmem>>, %arg2: memref<32x96xbf16, #tpu.memory_space<vmem>>, %arg3: memref<1x96xf32, #tpu.memory_space<vmem>>, %arg4: memref<16x96xf32, #tpu.memory_space<vmem>>) attributes {dimension_semantics = [#tpu.dimension_semantics<parallel>], iteration_bounds = array<i64: 1>, scalar_prefetch = 0 : i64, scratch_operands = 0 : i64, tpu.core_type = #tpu.core_type<tc>, window_params = [{transform_indices = @transform_0, window_bounds = array<i64: 16, 32>}, {pipeline_mode = #tpu.pipeline_mode<synchronous>, transform_indices = @transform_1, window_bounds = array<i64: 32, 96>}, {pipeline_mode = #tpu.pipeline_mode<synchronous>, transform_indices = @transform_2, window_bounds = array<i64: 1, 96>}, {transform_indices = @transform_3, window_bounds = array<i64: 16, 96>}]} {
    %c0 = arith.constant 0 : index
    %c0_0 = arith.constant 0 : index
    %0 = vector.load %arg1[%c0, %c0_0] : memref<16x32xf32, #tpu.memory_space<vmem>>, vector<16x32xf32>
    %1 = arith.truncf %0 : vector<16x32xf32> to vector<16x32xbf16>
    %c0_1 = arith.constant 0 : index
    %c0_2 = arith.constant 0 : index
    %2 = vector.load %arg2[%c0_1, %c0_2] : memref<32x96xbf16, #tpu.memory_space<vmem>>, vector<32x96xbf16>
    %cst = arith.constant dense<0.000000e+00> : vector<16x96xf32>
    %3 = tpu.matmul %1, %2, %cst {dimension_numbers = #tpu.dot_dimension_numbers<[1], [0], [0], [1], [0, 0, 1, 1], [], []>} : vector<16x32xbf16>, vector<32x96xbf16>, vector<16x96xf32> -> vector<16x96xf32>
    %c0_3 = arith.constant 0 : index
    %c0_4 = arith.constant 0 : index
    %4 = vector.load %arg3[%c0_3, %c0_4] : memref<1x96xf32, #tpu.memory_space<vmem>>, vector<1x96xf32>
    %5 = vector.broadcast %4 : vector<1x96xf32> to vector<16x96xf32>
    %6 = arith.addf %3, %5 : vector<16x96xf32>
    %c0_5 = arith.constant 0 : index
    %c0_6 = arith.constant 0 : index
    %7 = vector.load %arg4[%c0_5, %c0_6] : memref<16x96xf32, #tpu.memory_space<vmem>>, vector<16x96xf32>
    tpu.vector_store %arg4[%c0_5, %c0_6], %6 {strides = array<i32>} : memref<16x96xf32, #tpu.memory_space<vmem>>, vector<16x96xf32>,
    return
  }
  func.func @transform_0(%arg0: i32) -> (i32, i32) {
    %c0_i32 = arith.constant 0 : i32
    %c0_i32_0 = arith.constant 0 : i32
    return %arg0, %c0_i32 : i32, i32
  }
  func.func @transform_1(%arg0: i32) -> (i32, i32) {
    %c0_i32 = arith.constant 0 : i32
    %c0_i32_0 = arith.constant 0 : i32
    %c0_i32_1 = arith.constant 0 : i32
    return %c0_i32, %c0_i32_0 : i32, i32
  }
  func.func @transform_2(%arg0: i32) -> (i32, i32) {
    %c0_i32 = arith.constant 0 : i32
    %c0_i32_0 = arith.constant 0 : i32
    %c0_i32_1 = arith.constant 0 : i32
    return %c0_i32, %c0_i32_0 : i32, i32
  }
  func.func @transform_3(%arg0: i32) -> (i32, i32) {
    %c0_i32 = arith.constant 0 : i32
    %c0_i32_0 = arith.constant 0 : i32
    return %arg0, %c0_i32 : i32, i32
  }
}

module attributes {stable_mosaic.version = 11 : i64} {
  func.func @_proj_residual_ln_kernel(%arg0: i32, %arg1: memref<16x32xf32, #tpu.memory_space<vmem>>, %arg2: memref<32x32xbf16, #tpu.memory_space<vmem>>, %arg3: memref<1x32xf32, #tpu.memory_space<vmem>>, %arg4: memref<16x32xf32, #tpu.memory_space<vmem>>, %arg5: memref<1x32xf32, #tpu.memory_space<vmem>>, %arg6: memref<1x32xf32, #tpu.memory_space<vmem>>, %arg7: memref<16x32xf32, #tpu.memory_space<vmem>>) attributes {dimension_semantics = [#tpu.dimension_semantics<parallel>], iteration_bounds = array<i64: 1>, scalar_prefetch = 0 : i64, scratch_operands = 0 : i64, tpu.core_type = #tpu.core_type<tc>, window_params = [{transform_indices = @transform_0, window_bounds = array<i64: 16, 32>}, {pipeline_mode = #tpu.pipeline_mode<synchronous>, transform_indices = @transform_1, window_bounds = array<i64: 32, 32>}, {pipeline_mode = #tpu.pipeline_mode<synchronous>, transform_indices = @transform_2, window_bounds = array<i64: 1, 32>}, {transform_indices = @transform_3, window_bounds = array<i64: 16, 32>}, {pipeline_mode = #tpu.pipeline_mode<synchronous>, transform_indices = @transform_4, window_bounds = array<i64: 1, 32>}, {pipeline_mode = #tpu.pipeline_mode<synchronous>, transform_indices = @transform_5, window_bounds = array<i64: 1, 32>}, {transform_indices = @transform_6, window_bounds = array<i64: 16, 32>}]} {
    %c0 = arith.constant 0 : index
    %c0_0 = arith.constant 0 : index
    %0 = vector.load %arg1[%c0, %c0_0] : memref<16x32xf32, #tpu.memory_space<vmem>>, vector<16x32xf32>
    %1 = arith.truncf %0 : vector<16x32xf32> to vector<16x32xbf16>
    %c0_1 = arith.constant 0 : index
    %c0_2 = arith.constant 0 : index
    %2 = vector.load %arg2[%c0_1, %c0_2] : memref<32x32xbf16, #tpu.memory_space<vmem>>, vector<32x32xbf16>
    %cst = arith.constant dense<0.000000e+00> : vector<16x32xf32>
    %3 = tpu.matmul %1, %2, %cst {dimension_numbers = #tpu.dot_dimension_numbers<[1], [0], [0], [1], [0, 0, 1, 1], [], []>} : vector<16x32xbf16>, vector<32x32xbf16>, vector<16x32xf32> -> vector<16x32xf32>
    %c0_3 = arith.constant 0 : index
    %c0_4 = arith.constant 0 : index
    %4 = vector.load %arg3[%c0_3, %c0_4] : memref<1x32xf32, #tpu.memory_space<vmem>>, vector<1x32xf32>
    %5 = vector.broadcast %4 : vector<1x32xf32> to vector<16x32xf32>
    %6 = arith.addf %3, %5 : vector<16x32xf32>
    %c0_5 = arith.constant 0 : index
    %c0_6 = arith.constant 0 : index
    %7 = vector.load %arg4[%c0_5, %c0_6] : memref<16x32xf32, #tpu.memory_space<vmem>>, vector<16x32xf32>
    %8 = arith.addf %6, %7 : vector<16x32xf32>
    %cst_7 = arith.constant dense<0.000000e+00> : vector<16xf32>
    %9 = vector.multi_reduction <add>, %8, %cst_7 [1] : vector<16x32xf32> to vector<16xf32>
    %10 = vector.shape_cast %9 : vector<16xf32> to vector<16x1xf32>
    %cst_8 = arith.constant 3.200000e+01 : f32
    %11 = vector.broadcast %cst_8 : f32 to vector<16x1xf32>
    %12 = arith.divf %10, %11 : vector<16x1xf32>
    %13 = vector.broadcast %12 : vector<16x1xf32> to vector<16x32xf32>
    %14 = arith.subf %8, %13 : vector<16x32xf32>
    %15 = arith.mulf %14, %14 : vector<16x32xf32>
    %cst_9 = arith.constant dense<0.000000e+00> : vector<16xf32>
    %16 = vector.multi_reduction <add>, %15, %cst_9 [1] : vector<16x32xf32> to vector<16xf32>
    %17 = vector.shape_cast %16 : vector<16xf32> to vector<16x1xf32>
    %cst_10 = arith.constant 3.200000e+01 : f32
    %18 = vector.broadcast %cst_10 : f32 to vector<16x1xf32>
    %19 = arith.divf %17, %18 : vector<16x1xf32>
    %20 = vector.broadcast %12 : vector<16x1xf32> to vector<16x32xf32>
    %21 = arith.subf %8, %20 : vector<16x32xf32>
    %cst_11 = arith.constant 9.99999974E-6 : f32
    %22 = vector.broadcast %cst_11 : f32 to vector<16x1xf32>
    %23 = arith.addf %19, %22 : vector<16x1xf32>
    %24 = math.rsqrt %23 : vector<16x1xf32>
    %25 = vector.broadcast %24 : vector<16x1xf32> to vector<16x32xf32>
    %26 = arith.mulf %21, %25 : vector<16x32xf32>
    %c0_12 = arith.constant 0 : index
    %c0_13 = arith.constant 0 : index
    %27 = vector.load %arg5[%c0_12, %c0_13] : memref<1x32xf32, #tpu.memory_space<vmem>>, vector<1x32xf32>
    %28 = vector.broadcast %27 : vector<1x32xf32> to vector<16x32xf32>
    %29 = arith.mulf %26, %28 : vector<16x32xf32>
    %c0_14 = arith.constant 0 : index
    %c0_15 = arith.constant 0 : index
    %30 = vector.load %arg6[%c0_14, %c0_15] : memref<1x32xf32, #tpu.memory_space<vmem>>, vector<1x32xf32>
    %31 = vector.broadcast %30 : vector<1x32xf32> to vector<16x32xf32>
    %32 = arith.addf %29, %31 : vector<16x32xf32>
    %c0_16 = arith.constant 0 : index
    %c0_17 = arith.constant 0 : index
    %33 = vector.load %arg7[%c0_16, %c0_17] : memref<16x32xf32, #tpu.memory_space<vmem>>, vector<16x32xf32>
    tpu.vector_store %arg7[%c0_16, %c0_17], %32 {strides = array<i32>} : memref<16x32xf32, #tpu.memory_space<vmem>>, vector<16x32xf32>,
    return
  }
  func.func @transform_0(%arg0: i32) -> (i32, i32) {
    %c0_i32 = arith.constant 0 : i32
    %c0_i32_0 = arith.constant 0 : i32
    return %arg0, %c0_i32 : i32, i32
  }
  func.func @transform_1(%arg0: i32) -> (i32, i32) {
    %c0_i32 = arith.constant 0 : i32
    %c0_i32_0 = arith.constant 0 : i32
    %c0_i32_1 = arith.constant 0 : i32
    return %c0_i32, %c0_i32_0 : i32, i32
  }
  func.func @transform_2(%arg0: i32) -> (i32, i32) {
    %c0_i32 = arith.constant 0 : i32
    %c0_i32_0 = arith.constant 0 : i32
    %c0_i32_1 = arith.constant 0 : i32
    return %c0_i32, %c0_i32_0 : i32, i32
  }
  func.func @transform_3(%arg0: i32) -> (i32, i32) {
    %c0_i32 = arith.constant 0 : i32
    %c0_i32_0 = arith.constant 0 : i32
    return %arg0, %c0_i32 : i32, i32
  }
  func.func @transform_4(%arg0: i32) -> (i32, i32) {
    %c0_i32 = arith.constant 0 : i32
    %c0_i32_0 = arith.constant 0 : i32
    %c0_i32_1 = arith.constant 0 : i32
    return %c0_i32, %c0_i32_0 : i32, i32
  }
  func.func @transform_5(%arg0: i32) -> (i32, i32) {
    %c0_i32 = arith.constant 0 : i32
    %c0_i32_0 = arith.constant 0 : i32
    %c0_i32_1 = arith.constant 0 : i32
    return %c0_i32, %c0_i32_0 : i32, i32
  }
  func.func @transform_6(%arg0: i32) -> (i32, i32) {
    %c0_i32 = arith.constant 0 : i32
    %c0_i32_0 = arith.constant 0 : i32
    return %arg0, %c0_i32 : i32, i32
  }
}

module attributes {stable_mosaic.version = 11 : i64} {
  func.func @_ffn_ln_kernel(%arg0: i32, %arg1: memref<16x32xf32, #tpu.memory_space<vmem>>, %arg2: memref<32x64xbf16, #tpu.memory_space<vmem>>, %arg3: memref<1x64xf32, #tpu.memory_space<vmem>>, %arg4: memref<64x32xbf16, #tpu.memory_space<vmem>>, %arg5: memref<1x32xf32, #tpu.memory_space<vmem>>, %arg6: memref<1x32xf32, #tpu.memory_space<vmem>>, %arg7: memref<1x32xf32, #tpu.memory_space<vmem>>, %arg8: memref<16x32xf32, #tpu.memory_space<vmem>>) attributes {dimension_semantics = [#tpu.dimension_semantics<parallel>], iteration_bounds = array<i64: 1>, scalar_prefetch = 0 : i64, scratch_operands = 0 : i64, tpu.core_type = #tpu.core_type<tc>, window_params = [{transform_indices = @transform_0, window_bounds = array<i64: 16, 32>}, {pipeline_mode = #tpu.pipeline_mode<synchronous>, transform_indices = @transform_1, window_bounds = array<i64: 32, 64>}, {pipeline_mode = #tpu.pipeline_mode<synchronous>, transform_indices = @transform_2, window_bounds = array<i64: 1, 64>}, {pipeline_mode = #tpu.pipeline_mode<synchronous>, transform_indices = @transform_3, window_bounds = array<i64: 64, 32>}, {pipeline_mode = #tpu.pipeline_mode<synchronous>, transform_indices = @transform_4, window_bounds = array<i64: 1, 32>}, {pipeline_mode = #tpu.pipeline_mode<synchronous>, transform_indices = @transform_5, window_bounds = array<i64: 1, 32>}, {pipeline_mode = #tpu.pipeline_mode<synchronous>, transform_indices = @transform_6, window_bounds = array<i64: 1, 32>}, {transform_indices = @transform_7, window_bounds = array<i64: 16, 32>}]} {
    %c0 = arith.constant 0 : index
    %c0_0 = arith.constant 0 : index
    %0 = vector.load %arg1[%c0, %c0_0] : memref<16x32xf32, #tpu.memory_space<vmem>>, vector<16x32xf32>
    %1 = arith.truncf %0 : vector<16x32xf32> to vector<16x32xbf16>
    %c0_1 = arith.constant 0 : index
    %c0_2 = arith.constant 0 : index
    %2 = vector.load %arg2[%c0_1, %c0_2] : memref<32x64xbf16, #tpu.memory_space<vmem>>, vector<32x64xbf16>
    %cst = arith.constant dense<0.000000e+00> : vector<16x64xf32>
    %3 = tpu.matmul %1, %2, %cst {dimension_numbers = #tpu.dot_dimension_numbers<[1], [0], [0], [1], [0, 0, 1, 1], [], []>} : vector<16x32xbf16>, vector<32x64xbf16>, vector<16x64xf32> -> vector<16x64xf32>
    %c0_3 = arith.constant 0 : index
    %c0_4 = arith.constant 0 : index
    %4 = vector.load %arg3[%c0_3, %c0_4] : memref<1x64xf32, #tpu.memory_space<vmem>>, vector<1x64xf32>
    %5 = vector.broadcast %4 : vector<1x64xf32> to vector<16x64xf32>
    %6 = arith.addf %3, %5 : vector<16x64xf32>
    %cst_5 = arith.constant 0.000000e+00 : f32
    %7 = vector.broadcast %cst_5 : f32 to vector<16x64xf32>
    %8 = arith.maximumf %6, %7 : vector<16x64xf32>
    %9 = arith.truncf %8 : vector<16x64xf32> to vector<16x64xbf16>
    %c0_6 = arith.constant 0 : index
    %c0_7 = arith.constant 0 : index
    %10 = vector.load %arg4[%c0_6, %c0_7] : memref<64x32xbf16, #tpu.memory_space<vmem>>, vector<64x32xbf16>
    %cst_8 = arith.constant dense<0.000000e+00> : vector<16x32xf32>
    %11 = tpu.matmul %9, %10, %cst_8 {dimension_numbers = #tpu.dot_dimension_numbers<[1], [0], [0], [1], [0, 0, 1, 1], [], []>} : vector<16x64xbf16>, vector<64x32xbf16>, vector<16x32xf32> -> vector<16x32xf32>
    %c0_9 = arith.constant 0 : index
    %c0_10 = arith.constant 0 : index
    %12 = vector.load %arg5[%c0_9, %c0_10] : memref<1x32xf32, #tpu.memory_space<vmem>>, vector<1x32xf32>
    %13 = vector.broadcast %12 : vector<1x32xf32> to vector<16x32xf32>
    %14 = arith.addf %11, %13 : vector<16x32xf32>
    %15 = arith.addf %14, %0 : vector<16x32xf32>
    %cst_11 = arith.constant dense<0.000000e+00> : vector<16xf32>
    %16 = vector.multi_reduction <add>, %15, %cst_11 [1] : vector<16x32xf32> to vector<16xf32>
    %17 = vector.shape_cast %16 : vector<16xf32> to vector<16x1xf32>
    %cst_12 = arith.constant 3.200000e+01 : f32
    %18 = vector.broadcast %cst_12 : f32 to vector<16x1xf32>
    %19 = arith.divf %17, %18 : vector<16x1xf32>
    %20 = vector.broadcast %19 : vector<16x1xf32> to vector<16x32xf32>
    %21 = arith.subf %15, %20 : vector<16x32xf32>
    %22 = arith.mulf %21, %21 : vector<16x32xf32>
    %cst_13 = arith.constant dense<0.000000e+00> : vector<16xf32>
    %23 = vector.multi_reduction <add>, %22, %cst_13 [1] : vector<16x32xf32> to vector<16xf32>
    %24 = vector.shape_cast %23 : vector<16xf32> to vector<16x1xf32>
    %cst_14 = arith.constant 3.200000e+01 : f32
    %25 = vector.broadcast %cst_14 : f32 to vector<16x1xf32>
    %26 = arith.divf %24, %25 : vector<16x1xf32>
    %27 = vector.broadcast %19 : vector<16x1xf32> to vector<16x32xf32>
    %28 = arith.subf %15, %27 : vector<16x32xf32>
    %cst_15 = arith.constant 9.99999974E-6 : f32
    %29 = vector.broadcast %cst_15 : f32 to vector<16x1xf32>
    %30 = arith.addf %26, %29 : vector<16x1xf32>
    %31 = math.rsqrt %30 : vector<16x1xf32>
    %32 = vector.broadcast %31 : vector<16x1xf32> to vector<16x32xf32>
    %33 = arith.mulf %28, %32 : vector<16x32xf32>
    %c0_16 = arith.constant 0 : index
    %c0_17 = arith.constant 0 : index
    %34 = vector.load %arg6[%c0_16, %c0_17] : memref<1x32xf32, #tpu.memory_space<vmem>>, vector<1x32xf32>
    %35 = vector.broadcast %34 : vector<1x32xf32> to vector<16x32xf32>
    %36 = arith.mulf %33, %35 : vector<16x32xf32>
    %c0_18 = arith.constant 0 : index
    %c0_19 = arith.constant 0 : index
    %37 = vector.load %arg7[%c0_18, %c0_19] : memref<1x32xf32, #tpu.memory_space<vmem>>, vector<1x32xf32>
    %38 = vector.broadcast %37 : vector<1x32xf32> to vector<16x32xf32>
    %39 = arith.addf %36, %38 : vector<16x32xf32>
    %c0_20 = arith.constant 0 : index
    %c0_21 = arith.constant 0 : index
    %40 = vector.load %arg8[%c0_20, %c0_21] : memref<16x32xf32, #tpu.memory_space<vmem>>, vector<16x32xf32>
    tpu.vector_store %arg8[%c0_20, %c0_21], %39 {strides = array<i32>} : memref<16x32xf32, #tpu.memory_space<vmem>>, vector<16x32xf32>,
    return
  }
  func.func @transform_0(%arg0: i32) -> (i32, i32) {
    %c0_i32 = arith.constant 0 : i32
    %c0_i32_0 = arith.constant 0 : i32
    return %arg0, %c0_i32 : i32, i32
  }
  func.func @transform_1(%arg0: i32) -> (i32, i32) {
    %c0_i32 = arith.constant 0 : i32
    %c0_i32_0 = arith.constant 0 : i32
    %c0_i32_1 = arith.constant 0 : i32
    return %c0_i32, %c0_i32_0 : i32, i32
  }
  func.func @transform_2(%arg0: i32) -> (i32, i32) {
    %c0_i32 = arith.constant 0 : i32
    %c0_i32_0 = arith.constant 0 : i32
    %c0_i32_1 = arith.constant 0 : i32
    return %c0_i32, %c0_i32_0 : i32, i32
  }
  func.func @transform_3(%arg0: i32) -> (i32, i32) {
    %c0_i32 = arith.constant 0 : i32
    %c0_i32_0 = arith.constant 0 : i32
    %c0_i32_1 = arith.constant 0 : i32
    return %c0_i32, %c0_i32_0 : i32, i32
  }
  func.func @transform_4(%arg0: i32) -> (i32, i32) {
    %c0_i32 = arith.constant 0 : i32
    %c0_i32_0 = arith.constant 0 : i32
    %c0_i32_1 = arith.constant 0 : i32
    return %c0_i32, %c0_i32_0 : i32, i32
  }
  func.func @transform_5(%arg0: i32) -> (i32, i32) {
    %c0_i32 = arith.constant 0 : i32
    %c0_i32_0 = arith.constant 0 : i32
    %c0_i32_1 = arith.constant 0 : i32
    return %c0_i32, %c0_i32_0 : i32, i32
  }
  func.func @transform_6(%arg0: i32) -> (i32, i32) {
    %c0_i32 = arith.constant 0 : i32
    %c0_i32_0 = arith.constant 0 : i32
    %c0_i32_1 = arith.constant 0 : i32
    return %c0_i32, %c0_i32_0 : i32, i32
  }
  func.func @transform_7(%arg0: i32) -> (i32, i32) {
    %c0_i32 = arith.constant 0 : i32
    %c0_i32_0 = arith.constant 0 : i32
    return %arg0, %c0_i32 : i32, i32
  }
}

module attributes {stable_mosaic.version = 11 : i64} {
  func.func @_attn_kernel(%arg0: i32, %arg1: memref<1x8x32xf32, #tpu.memory_space<vmem>>, %arg2: memref<1x8x32xf32, #tpu.memory_space<vmem>>, %arg3: memref<1x8x32xf32, #tpu.memory_space<vmem>>, %arg4: memref<1x1x8xi32, #tpu.memory_space<vmem>>, %arg5: memref<1x8x32xf32, #tpu.memory_space<vmem>>, %arg6: memref<1x4x8x8xf32, #tpu.memory_space<vmem>>) attributes {dimension_semantics = [#tpu.dimension_semantics<parallel>], iteration_bounds = array<i64: 2>, scalar_prefetch = 0 : i64, scratch_operands = 0 : i64, tpu.core_type = #tpu.core_type<tc>, window_params = [{transform_indices = @transform_0, window_bounds = array<i64: 1, 8, 32>}, {transform_indices = @transform_1, window_bounds = array<i64: 1, 8, 32>}, {transform_indices = @transform_2, window_bounds = array<i64: 1, 8, 32>}, {transform_indices = @transform_3, window_bounds = array<i64: 1, 1, 8>}, {transform_indices = @transform_4, window_bounds = array<i64: 1, 8, 32>}, {transform_indices = @transform_5, window_bounds = array<i64: 1, 4, 8, 8>}]} {
    %c0 = arith.constant 0 : index
    %c0_0 = arith.constant 0 : index
    %c0_1 = arith.constant 0 : index
    %0 = vector.load %arg1[%c0, %c0_0, %c0_1] : memref<1x8x32xf32, #tpu.memory_space<vmem>>, vector<1x8x32xf32>
    %1 = vector.shape_cast %0 : vector<1x8x32xf32> to vector<8x32xf32>
    %2 = arith.truncf %1 : vector<8x32xf32> to vector<8x32xbf16>
    %c0_2 = arith.constant 0 : index
    %c0_3 = arith.constant 0 : index
    %c0_4 = arith.constant 0 : index
    %3 = vector.load %arg2[%c0_2, %c0_3, %c0_4] : memref<1x8x32xf32, #tpu.memory_space<vmem>>, vector<1x8x32xf32>
    %4 = vector.shape_cast %3 : vector<1x8x32xf32> to vector<8x32xf32>
    %5 = arith.truncf %4 : vector<8x32xf32> to vector<8x32xbf16>
    %c0_5 = arith.constant 0 : index
    %c0_6 = arith.constant 0 : index
    %c0_7 = arith.constant 0 : index
    %6 = vector.load %arg3[%c0_5, %c0_6, %c0_7] : memref<1x8x32xf32, #tpu.memory_space<vmem>>, vector<1x8x32xf32>
    %7 = vector.shape_cast %6 : vector<1x8x32xf32> to vector<8x32xf32>
    %8 = arith.truncf %7 : vector<8x32xf32> to vector<8x32xbf16>
    %c0_8 = arith.constant 0 : index
    %c0_9 = arith.constant 0 : index
    %c0_10 = arith.constant 0 : index
    %9 = vector.load %arg4[%c0_8, %c0_9, %c0_10] : memref<1x1x8xi32, #tpu.memory_space<vmem>>, vector<1x1x8xi32>
    %10 = vector.shape_cast %9 : vector<1x1x8xi32> to vector<1x8xi32>
    %c0_i32 = arith.constant 0 : i32
    %11 = vector.broadcast %c0_i32 : i32 to vector<1x8xi32>
    %12 = arith.cmpi sgt, %10, %11 : vector<1x8xi32>
    %13 = vector.extract_strided_slice %2 {offsets = [0, 0], sizes = [8, 8], strides = [1, 1]} : vector<8x32xbf16> to vector<8x8xbf16>
    %14 = vector.extract_strided_slice %5 {offsets = [0, 0], sizes = [8, 8], strides = [1, 1]} : vector<8x32xbf16> to vector<8x8xbf16>
    %15 = vector.extract_strided_slice %8 {offsets = [0, 0], sizes = [8, 8], strides = [1, 1]} : vector<8x32xbf16> to vector<8x8xbf16>
    %cst = arith.constant dense<0.000000e+00> : vector<8x8xf32>
    %16 = tpu.matmul %13, %14, %cst {dimension_numbers = #tpu.dot_dimension_numbers<[1], [1], [0], [0], [0, 0, 1, 0], [], []>} : vector<8x8xbf16>, vector<8x8xbf16>, vector<8x8xf32> -> vector<8x8xf32>
    %cst_11 = arith.constant 0.353553385 : f32
    %17 = vector.broadcast %cst_11 : f32 to vector<8x8xf32>
    %18 = arith.mulf %16, %17 : vector<8x8xf32>
    %cst_12 = arith.constant -1.000000e+30 : f32
    %19 = vector.shape_cast %12 : vector<1x8xi1> to vector<1x8xi1>
    %20 = vector.broadcast %19 : vector<1x8xi1> to vector<8x8xi1>
    %21 = vector.broadcast %cst_12 : f32 to vector<8x8xf32>
    %22 = arith.select %20, %21, %18 : vector<8x8xi1>, vector<8x8xf32>
    %cst_13 = arith.constant dense<0xFF800000> : vector<8xf32>
    %23 = vector.multi_reduction <maximumf>, %22, %cst_13 [1] : vector<8x8xf32> to vector<8xf32>
    %24 = vector.shape_cast %23 : vector<8xf32> to vector<8x1xf32>
    %25 = vector.broadcast %24 : vector<8x1xf32> to vector<8x8xf32>
    %26 = arith.subf %22, %25 : vector<8x8xf32>
    %27 = math.exp %26 : vector<8x8xf32>
    %cst_14 = arith.constant dense<0.000000e+00> : vector<8xf32>
    %28 = vector.multi_reduction <add>, %27, %cst_14 [1] : vector<8x8xf32> to vector<8xf32>
    %29 = vector.shape_cast %28 : vector<8xf32> to vector<8x1xf32>
    %30 = vector.broadcast %29 : vector<8x1xf32> to vector<8x8xf32>
    %31 = arith.divf %27, %30 : vector<8x8xf32>
    %c0_15 = arith.constant 0 : index
    %c0_16 = arith.constant 0 : index
    %c0_17 = arith.constant 0 : index
    %c0_18 = arith.constant 0 : index
    %32 = vector.load %arg6[%c0_15, %c0_16, %c0_17, %c0_18] : memref<1x4x8x8xf32, #tpu.memory_space<vmem>>, vector<1x1x8x8xf32>
    %33 = vector.shape_cast %32 : vector<1x1x8x8xf32> to vector<8x8xf32>
    %34 = vector.shape_cast %31 : vector<8x8xf32> to vector<1x1x8x8xf32>
    tpu.vector_store %arg6[%c0_15, %c0_16, %c0_17, %c0_18], %34 {strides = array<i32>} : memref<1x4x8x8xf32, #tpu.memory_space<vmem>>, vector<1x1x8x8xf32>,
    %35 = arith.truncf %31 : vector<8x8xf32> to vector<8x8xbf16>
    %cst_19 = arith.constant dense<0.000000e+00> : vector<8x8xf32>
    %36 = tpu.matmul %35, %15, %cst_19 {dimension_numbers = #tpu.dot_dimension_numbers<[1], [0], [0], [1], [0, 0, 1, 1], [], []>} : vector<8x8xbf16>, vector<8x8xbf16>, vector<8x8xf32> -> vector<8x8xf32>
    %37 = vector.extract_strided_slice %2 {offsets = [0, 8], sizes = [8, 8], strides = [1, 1]} : vector<8x32xbf16> to vector<8x8xbf16>
    %38 = vector.extract_strided_slice %5 {offsets = [0, 8], sizes = [8, 8], strides = [1, 1]} : vector<8x32xbf16> to vector<8x8xbf16>
    %39 = vector.extract_strided_slice %8 {offsets = [0, 8], sizes = [8, 8], strides = [1, 1]} : vector<8x32xbf16> to vector<8x8xbf16>
    %cst_20 = arith.constant dense<0.000000e+00> : vector<8x8xf32>
    %40 = tpu.matmul %37, %38, %cst_20 {dimension_numbers = #tpu.dot_dimension_numbers<[1], [1], [0], [0], [0, 0, 1, 0], [], []>} : vector<8x8xbf16>, vector<8x8xbf16>, vector<8x8xf32> -> vector<8x8xf32>
    %cst_21 = arith.constant 0.353553385 : f32
    %41 = vector.broadcast %cst_21 : f32 to vector<8x8xf32>
    %42 = arith.mulf %40, %41 : vector<8x8xf32>
    %cst_22 = arith.constant -1.000000e+30 : f32
    %43 = vector.shape_cast %12 : vector<1x8xi1> to vector<1x8xi1>
    %44 = vector.broadcast %43 : vector<1x8xi1> to vector<8x8xi1>
    %45 = vector.broadcast %cst_22 : f32 to vector<8x8xf32>
    %46 = arith.select %44, %45, %42 : vector<8x8xi1>, vector<8x8xf32>
    %cst_23 = arith.constant dense<0xFF800000> : vector<8xf32>
    %47 = vector.multi_reduction <maximumf>, %46, %cst_23 [1] : vector<8x8xf32> to vector<8xf32>
    %48 = vector.shape_cast %47 : vector<8xf32> to vector<8x1xf32>
    %49 = vector.broadcast %48 : vector<8x1xf32> to vector<8x8xf32>
    %50 = arith.subf %46, %49 : vector<8x8xf32>
    %51 = math.exp %50 : vector<8x8xf32>
    %cst_24 = arith.constant dense<0.000000e+00> : vector<8xf32>
    %52 = vector.multi_reduction <add>, %51, %cst_24 [1] : vector<8x8xf32> to vector<8xf32>
    %53 = vector.shape_cast %52 : vector<8xf32> to vector<8x1xf32>
    %54 = vector.broadcast %53 : vector<8x1xf32> to vector<8x8xf32>
    %55 = arith.divf %51, %54 : vector<8x8xf32>
    %c0_25 = arith.constant 0 : index
    %c1 = arith.constant 1 : index
    %c0_26 = arith.constant 0 : index
    %c0_27 = arith.constant 0 : index
    %56 = vector.load %arg6[%c0_25, %c1, %c0_26, %c0_27] : memref<1x4x8x8xf32, #tpu.memory_space<vmem>>, vector<1x1x8x8xf32>
    %57 = vector.shape_cast %56 : vector<1x1x8x8xf32> to vector<8x8xf32>
    %58 = vector.shape_cast %55 : vector<8x8xf32> to vector<1x1x8x8xf32>
    tpu.vector_store %arg6[%c0_25, %c1, %c0_26, %c0_27], %58 {strides = array<i32>} : memref<1x4x8x8xf32, #tpu.memory_space<vmem>>, vector<1x1x8x8xf32>,
    %59 = arith.truncf %55 : vector<8x8xf32> to vector<8x8xbf16>
    %cst_28 = arith.constant dense<0.000000e+00> : vector<8x8xf32>
    %60 = tpu.matmul %59, %39, %cst_28 {dimension_numbers = #tpu.dot_dimension_numbers<[1], [0], [0], [1], [0, 0, 1, 1], [], []>} : vector<8x8xbf16>, vector<8x8xbf16>, vector<8x8xf32> -> vector<8x8xf32>
    %61 = vector.extract_strided_slice %2 {offsets = [0, 16], sizes = [8, 8], strides = [1, 1]} : vector<8x32xbf16> to vector<8x8xbf16>
    %62 = vector.extract_strided_slice %5 {offsets = [0, 16], sizes = [8, 8], strides = [1, 1]} : vector<8x32xbf16> to vector<8x8xbf16>
    %63 = vector.extract_strided_slice %8 {offsets = [0, 16], sizes = [8, 8], strides = [1, 1]} : vector<8x32xbf16> to vector<8x8xbf16>
    %cst_29 = arith.constant dense<0.000000e+00> : vector<8x8xf32>
    %64 = tpu.matmul %61, %62, %cst_29 {dimension_numbers = #tpu.dot_dimension_numbers<[1], [1], [0], [0], [0, 0, 1, 0], [], []>} : vector<8x8xbf16>, vector<8x8xbf16>, vector<8x8xf32> -> vector<8x8xf32>
    %cst_30 = arith.constant 0.353553385 : f32
    %65 = vector.broadcast %cst_30 : f32 to vector<8x8xf32>
    %66 = arith.mulf %64, %65 : vector<8x8xf32>
    %cst_31 = arith.constant -1.000000e+30 : f32
    %67 = vector.shape_cast %12 : vector<1x8xi1> to vector<1x8xi1>
    %68 = vector.broadcast %67 : vector<1x8xi1> to vector<8x8xi1>
    %69 = vector.broadcast %cst_31 : f32 to vector<8x8xf32>
    %70 = arith.select %68, %69, %66 : vector<8x8xi1>, vector<8x8xf32>
    %cst_32 = arith.constant dense<0xFF800000> : vector<8xf32>
    %71 = vector.multi_reduction <maximumf>, %70, %cst_32 [1] : vector<8x8xf32> to vector<8xf32>
    %72 = vector.shape_cast %71 : vector<8xf32> to vector<8x1xf32>
    %73 = vector.broadcast %72 : vector<8x1xf32> to vector<8x8xf32>
    %74 = arith.subf %70, %73 : vector<8x8xf32>
    %75 = math.exp %74 : vector<8x8xf32>
    %cst_33 = arith.constant dense<0.000000e+00> : vector<8xf32>
    %76 = vector.multi_reduction <add>, %75, %cst_33 [1] : vector<8x8xf32> to vector<8xf32>
    %77 = vector.shape_cast %76 : vector<8xf32> to vector<8x1xf32>
    %78 = vector.broadcast %77 : vector<8x1xf32> to vector<8x8xf32>
    %79 = arith.divf %75, %78 : vector<8x8xf32>
    %c0_34 = arith.constant 0 : index
    %c2 = arith.constant 2 : index
    %c0_35 = arith.constant 0 : index
    %c0_36 = arith.constant 0 : index
    %80 = vector.load %arg6[%c0_34, %c2, %c0_35, %c0_36] : memref<1x4x8x8xf32, #tpu.memory_space<vmem>>, vector<1x1x8x8xf32>
    %81 = vector.shape_cast %80 : vector<1x1x8x8xf32> to vector<8x8xf32>
    %82 = vector.shape_cast %79 : vector<8x8xf32> to vector<1x1x8x8xf32>
    tpu.vector_store %arg6[%c0_34, %c2, %c0_35, %c0_36], %82 {strides = array<i32>} : memref<1x4x8x8xf32, #tpu.memory_space<vmem>>, vector<1x1x8x8xf32>,
    %83 = arith.truncf %79 : vector<8x8xf32> to vector<8x8xbf16>
    %cst_37 = arith.constant dense<0.000000e+00> : vector<8x8xf32>
    %84 = tpu.matmul %83, %63, %cst_37 {dimension_numbers = #tpu.dot_dimension_numbers<[1], [0], [0], [1], [0, 0, 1, 1], [], []>} : vector<8x8xbf16>, vector<8x8xbf16>, vector<8x8xf32> -> vector<8x8xf32>
    %85 = vector.extract_strided_slice %2 {offsets = [0, 24], sizes = [8, 8], strides = [1, 1]} : vector<8x32xbf16> to vector<8x8xbf16>
    %86 = vector.extract_strided_slice %5 {offsets = [0, 24], sizes = [8, 8], strides = [1, 1]} : vector<8x32xbf16> to vector<8x8xbf16>
    %87 = vector.extract_strided_slice %8 {offsets = [0, 24], sizes = [8, 8], strides = [1, 1]} : vector<8x32xbf16> to vector<8x8xbf16>
    %cst_38 = arith.constant dense<0.000000e+00> : vector<8x8xf32>
    %88 = tpu.matmul %85, %86, %cst_38 {dimension_numbers = #tpu.dot_dimension_numbers<[1], [1], [0], [0], [0, 0, 1, 0], [], []>} : vector<8x8xbf16>, vector<8x8xbf16>, vector<8x8xf32> -> vector<8x8xf32>
    %cst_39 = arith.constant 0.353553385 : f32
    %89 = vector.broadcast %cst_39 : f32 to vector<8x8xf32>
    %90 = arith.mulf %88, %89 : vector<8x8xf32>
    %cst_40 = arith.constant -1.000000e+30 : f32
    %91 = vector.shape_cast %12 : vector<1x8xi1> to vector<1x8xi1>
    %92 = vector.broadcast %91 : vector<1x8xi1> to vector<8x8xi1>
    %93 = vector.broadcast %cst_40 : f32 to vector<8x8xf32>
    %94 = arith.select %92, %93, %90 : vector<8x8xi1>, vector<8x8xf32>
    %cst_41 = arith.constant dense<0xFF800000> : vector<8xf32>
    %95 = vector.multi_reduction <maximumf>, %94, %cst_41 [1] : vector<8x8xf32> to vector<8xf32>
    %96 = vector.shape_cast %95 : vector<8xf32> to vector<8x1xf32>
    %97 = vector.broadcast %96 : vector<8x1xf32> to vector<8x8xf32>
    %98 = arith.subf %94, %97 : vector<8x8xf32>
    %99 = math.exp %98 : vector<8x8xf32>
    %cst_42 = arith.constant dense<0.000000e+00> : vector<8xf32>
    %100 = vector.multi_reduction <add>, %99, %cst_42 [1] : vector<8x8xf32> to vector<8xf32>
    %101 = vector.shape_cast %100 : vector<8xf32> to vector<8x1xf32>
    %102 = vector.broadcast %101 : vector<8x1xf32> to vector<8x8xf32>
    %103 = arith.divf %99, %102 : vector<8x8xf32>
    %c0_43 = arith.constant 0 : index
    %c3 = arith.constant 3 : index
    %c0_44 = arith.constant 0 : index
    %c0_45 = arith.constant 0 : index
    %104 = vector.load %arg6[%c0_43, %c3, %c0_44, %c0_45] : memref<1x4x8x8xf32, #tpu.memory_space<vmem>>, vector<1x1x8x8xf32>
    %105 = vector.shape_cast %104 : vector<1x1x8x8xf32> to vector<8x8xf32>
    %106 = vector.shape_cast %103 : vector<8x8xf32> to vector<1x1x8x8xf32>
    tpu.vector_store %arg6[%c0_43, %c3, %c0_44, %c0_45], %106 {strides = array<i32>} : memref<1x4x8x8xf32, #tpu.memory_space<vmem>>, vector<1x1x8x8xf32>,
    %107 = arith.truncf %103 : vector<8x8xf32> to vector<8x8xbf16>
    %cst_46 = arith.constant dense<0.000000e+00> : vector<8x8xf32>
    %108 = tpu.matmul %107, %87, %cst_46 {dimension_numbers = #tpu.dot_dimension_numbers<[1], [0], [0], [1], [0, 0, 1, 1], [], []>} : vector<8x8xbf16>, vector<8x8xbf16>, vector<8x8xf32> -> vector<8x8xf32>
    %109 = tpu.concatenate %36, %60, %84, %108 in 1 : vector<8x8xf32>, vector<8x8xf32>, vector<8x8xf32>, vector<8x8xf32> -> vector<8x32xf32>
    %c0_47 = arith.constant 0 : index
    %c0_48 = arith.constant 0 : index
    %c0_49 = arith.constant 0 : index
    %110 = vector.load %arg5[%c0_47, %c0_48, %c0_49] : memref<1x8x32xf32, #tpu.memory_space<vmem>>, vector<1x8x32xf32>
    %111 = vector.shape_cast %110 : vector<1x8x32xf32> to vector<8x32xf32>
    %112 = vector.shape_cast %109 : vector<8x32xf32> to vector<1x8x32xf32>
    tpu.vector_store %arg5[%c0_47, %c0_48, %c0_49], %112 {strides = array<i32>} : memref<1x8x32xf32, #tpu.memory_space<vmem>>, vector<1x8x32xf32>,
    return
  }
  func.func @transform_0(%arg0: i32) -> (i32, i32, i32) {
    %c0_i32 = arith.constant 0 : i32
    %c0_i32_0 = arith.constant 0 : i32
    %c0_i32_1 = arith.constant 0 : i32
    return %arg0, %c0_i32, %c0_i32_0 : i32, i32, i32
  }
  func.func @transform_1(%arg0: i32) -> (i32, i32, i32) {
    %c0_i32 = arith.constant 0 : i32
    %c0_i32_0 = arith.constant 0 : i32
    %c0_i32_1 = arith.constant 0 : i32
    return %arg0, %c0_i32, %c0_i32_0 : i32, i32, i32
  }
  func.func @transform_2(%arg0: i32) -> (i32, i32, i32) {
    %c0_i32 = arith.constant 0 : i32
    %c0_i32_0 = arith.constant 0 : i32
    %c0_i32_1 = arith.constant 0 : i32
    return %arg0, %c0_i32, %c0_i32_0 : i32, i32, i32
  }
  func.func @transform_3(%arg0: i32) -> (i32, i32, i32) {
    %c0_i32 = arith.constant 0 : i32
    %c0_i32_0 = arith.constant 0 : i32
    %c0_i32_1 = arith.constant 0 : i32
    return %arg0, %c0_i32, %c0_i32_0 : i32, i32, i32
  }
  func.func @transform_4(%arg0: i32) -> (i32, i32, i32) {
    %c0_i32 = arith.constant 0 : i32
    %c0_i32_0 = arith.constant 0 : i32
    %c0_i32_1 = arith.constant 0 : i32
    return %arg0, %c0_i32, %c0_i32_0 : i32, i32, i32
  }
  func.func @transform_5(%arg0: i32) -> (i32, i32, i32, i32) {
    %c0_i32 = arith.constant 0 : i32
    %c0_i32_0 = arith.constant 0 : i32
    %c0_i32_1 = arith.constant 0 : i32
    %c0_i32_2 = arith.constant 0 : i32
    return %arg0, %c0_i32, %c0_i32_0, %c0_i32_1 : i32, i32, i32, i32
  }
}

module attributes {stable_mosaic.version = 11 : i64} {
  func.func @_linear_kernel(%arg0: i32, %arg1: memref<16x32xf32, #tpu.memory_space<vmem>>, %arg2: memref<32x64xbf16, #tpu.memory_space<vmem>>, %arg3: memref<1x64xf32, #tpu.memory_space<vmem>>, %arg4: memref<16x64xf32, #tpu.memory_space<vmem>>) attributes {dimension_semantics = [#tpu.dimension_semantics<parallel>], iteration_bounds = array<i64: 1>, scalar_prefetch = 0 : i64, scratch_operands = 0 : i64, tpu.core_type = #tpu.core_type<tc>, window_params = [{transform_indices = @transform_0, window_bounds = array<i64: 16, 32>}, {pipeline_mode = #tpu.pipeline_mode<synchronous>, transform_indices = @transform_1, window_bounds = array<i64: 32, 64>}, {pipeline_mode = #tpu.pipeline_mode<synchronous>, transform_indices = @transform_2, window_bounds = array<i64: 1, 64>}, {transform_indices = @transform_3, window_bounds = array<i64: 16, 64>}]} {
    %c0 = arith.constant 0 : index
    %c0_0 = arith.constant 0 : index
    %0 = vector.load %arg1[%c0, %c0_0] : memref<16x32xf32, #tpu.memory_space<vmem>>, vector<16x32xf32>
    %1 = arith.truncf %0 : vector<16x32xf32> to vector<16x32xbf16>
    %c0_1 = arith.constant 0 : index
    %c0_2 = arith.constant 0 : index
    %2 = vector.load %arg2[%c0_1, %c0_2] : memref<32x64xbf16, #tpu.memory_space<vmem>>, vector<32x64xbf16>
    %cst = arith.constant dense<0.000000e+00> : vector<16x64xf32>
    %3 = tpu.matmul %1, %2, %cst {dimension_numbers = #tpu.dot_dimension_numbers<[1], [0], [0], [1], [0, 0, 1, 1], [], []>} : vector<16x32xbf16>, vector<32x64xbf16>, vector<16x64xf32> -> vector<16x64xf32>
    %c0_3 = arith.constant 0 : index
    %c0_4 = arith.constant 0 : index
    %4 = vector.load %arg3[%c0_3, %c0_4] : memref<1x64xf32, #tpu.memory_space<vmem>>, vector<1x64xf32>
    %5 = vector.broadcast %4 : vector<1x64xf32> to vector<16x64xf32>
    %6 = arith.addf %3, %5 : vector<16x64xf32>
    %c0_5 = arith.constant 0 : index
    %c0_6 = arith.constant 0 : index
    %7 = vector.load %arg4[%c0_5, %c0_6] : memref<16x64xf32, #tpu.memory_space<vmem>>, vector<16x64xf32>
    tpu.vector_store %arg4[%c0_5, %c0_6], %6 {strides = array<i32>} : memref<16x64xf32, #tpu.memory_space<vmem>>, vector<16x64xf32>,
    return
  }
  func.func @transform_0(%arg0: i32) -> (i32, i32) {
    %c0_i32 = arith.constant 0 : i32
    %c0_i32_0 = arith.constant 0 : i32
    return %arg0, %c0_i32 : i32, i32
  }
  func.func @transform_1(%arg0: i32) -> (i32, i32) {
    %c0_i32 = arith.constant 0 : i32
    %c0_i32_0 = arith.constant 0 : i32
    %c0_i32_1 = arith.constant 0 : i32
    return %c0_i32, %c0_i32_0 : i32, i32
  }
  func.func @transform_2(%arg0: i32) -> (i32, i32) {
    %c0_i32 = arith.constant 0 : i32
    %c0_i32_0 = arith.constant 0 : i32
    %c0_i32_1 = arith.constant 0 : i32
    return %c0_i32, %c0_i32_0 : i32, i32
  }
  func.func @transform_3(%arg0: i32) -> (i32, i32) {
    %c0_i32 = arith.constant 0 : i32
    %c0_i32_0 = arith.constant 0 : i32
    return %arg0, %c0_i32 : i32, i32
  }
}

module attributes {stable_mosaic.version = 11 : i64} {
  func.func @_linear_kernel(%arg0: i32, %arg1: memref<16x32xf32, #tpu.memory_space<vmem>>, %arg2: memref<32x32xbf16, #tpu.memory_space<vmem>>, %arg3: memref<1x32xf32, #tpu.memory_space<vmem>>, %arg4: memref<16x32xf32, #tpu.memory_space<vmem>>) attributes {dimension_semantics = [#tpu.dimension_semantics<parallel>], iteration_bounds = array<i64: 1>, scalar_prefetch = 0 : i64, scratch_operands = 0 : i64, tpu.core_type = #tpu.core_type<tc>, window_params = [{transform_indices = @transform_0, window_bounds = array<i64: 16, 32>}, {pipeline_mode = #tpu.pipeline_mode<synchronous>, transform_indices = @transform_1, window_bounds = array<i64: 32, 32>}, {pipeline_mode = #tpu.pipeline_mode<synchronous>, transform_indices = @transform_2, window_bounds = array<i64: 1, 32>}, {transform_indices = @transform_3, window_bounds = array<i64: 16, 32>}]} {
    %c0 = arith.constant 0 : index
    %c0_0 = arith.constant 0 : index
    %0 = vector.load %arg1[%c0, %c0_0] : memref<16x32xf32, #tpu.memory_space<vmem>>, vector<16x32xf32>
    %1 = arith.truncf %0 : vector<16x32xf32> to vector<16x32xbf16>
    %c0_1 = arith.constant 0 : index
    %c0_2 = arith.constant 0 : index
    %2 = vector.load %arg2[%c0_1, %c0_2] : memref<32x32xbf16, #tpu.memory_space<vmem>>, vector<32x32xbf16>
    %cst = arith.constant dense<0.000000e+00> : vector<16x32xf32>
    %3 = tpu.matmul %1, %2, %cst {dimension_numbers = #tpu.dot_dimension_numbers<[1], [0], [0], [1], [0, 0, 1, 1], [], []>} : vector<16x32xbf16>, vector<32x32xbf16>, vector<16x32xf32> -> vector<16x32xf32>
    %c0_3 = arith.constant 0 : index
    %c0_4 = arith.constant 0 : index
    %4 = vector.load %arg3[%c0_3, %c0_4] : memref<1x32xf32, #tpu.memory_space<vmem>>, vector<1x32xf32>
    %5 = vector.broadcast %4 : vector<1x32xf32> to vector<16x32xf32>
    %6 = arith.addf %3, %5 : vector<16x32xf32>
    %c0_5 = arith.constant 0 : index
    %c0_6 = arith.constant 0 : index
    %7 = vector.load %arg4[%c0_5, %c0_6] : memref<16x32xf32, #tpu.memory_space<vmem>>, vector<16x32xf32>
    tpu.vector_store %arg4[%c0_5, %c0_6], %6 {strides = array<i32>} : memref<16x32xf32, #tpu.memory_space<vmem>>, vector<16x32xf32>,
    return
  }
  func.func @transform_0(%arg0: i32) -> (i32, i32) {
    %c0_i32 = arith.constant 0 : i32
    %c0_i32_0 = arith.constant 0 : i32
    return %arg0, %c0_i32 : i32, i32
  }
  func.func @transform_1(%arg0: i32) -> (i32, i32) {
    %c0_i32 = arith.constant 0 : i32
    %c0_i32_0 = arith.constant 0 : i32
    %c0_i32_1 = arith.constant 0 : i32
    return %c0_i32, %c0_i32_0 : i32, i32
  }
  func.func @transform_2(%arg0: i32) -> (i32, i32) {
    %c0_i32 = arith.constant 0 : i32
    %c0_i32_0 = arith.constant 0 : i32
    %c0_i32_1 = arith.constant 0 : i32
    return %c0_i32, %c0_i32_0 : i32, i32
  }
  func.func @transform_3(%arg0: i32) -> (i32, i32) {
    %c0_i32 = arith.constant 0 : i32
    %c0_i32_0 = arith.constant 0 : i32
    return %arg0, %c0_i32 : i32, i32
  }
}

module attributes {stable_mosaic.version = 11 : i64} {
  func.func @_attn_kernel(%arg0: i32, %arg1: memref<1x8x32xf32, #tpu.memory_space<vmem>>, %arg2: memref<1x8x32xf32, #tpu.memory_space<vmem>>, %arg3: memref<1x8x32xf32, #tpu.memory_space<vmem>>, %arg4: memref<1x1x8xi32, #tpu.memory_space<vmem>>, %arg5: memref<1x8x32xf32, #tpu.memory_space<vmem>>, %arg6: memref<1x4x8x8xf32, #tpu.memory_space<vmem>>) attributes {dimension_semantics = [#tpu.dimension_semantics<parallel>], iteration_bounds = array<i64: 2>, scalar_prefetch = 0 : i64, scratch_operands = 0 : i64, tpu.core_type = #tpu.core_type<tc>, window_params = [{transform_indices = @transform_0, window_bounds = array<i64: 1, 8, 32>}, {transform_indices = @transform_1, window_bounds = array<i64: 1, 8, 32>}, {transform_indices = @transform_2, window_bounds = array<i64: 1, 8, 32>}, {transform_indices = @transform_3, window_bounds = array<i64: 1, 1, 8>}, {transform_indices = @transform_4, window_bounds = array<i64: 1, 8, 32>}, {transform_indices = @transform_5, window_bounds = array<i64: 1, 4, 8, 8>}]} {
    %c0 = arith.constant 0 : index
    %c0_0 = arith.constant 0 : index
    %c0_1 = arith.constant 0 : index
    %0 = vector.load %arg1[%c0, %c0_0, %c0_1] : memref<1x8x32xf32, #tpu.memory_space<vmem>>, vector<1x8x32xf32>
    %1 = vector.shape_cast %0 : vector<1x8x32xf32> to vector<8x32xf32>
    %2 = arith.truncf %1 : vector<8x32xf32> to vector<8x32xbf16>
    %c0_2 = arith.constant 0 : index
    %c0_3 = arith.constant 0 : index
    %c0_4 = arith.constant 0 : index
    %3 = vector.load %arg2[%c0_2, %c0_3, %c0_4] : memref<1x8x32xf32, #tpu.memory_space<vmem>>, vector<1x8x32xf32>
    %4 = vector.shape_cast %3 : vector<1x8x32xf32> to vector<8x32xf32>
    %5 = arith.truncf %4 : vector<8x32xf32> to vector<8x32xbf16>
    %c0_5 = arith.constant 0 : index
    %c0_6 = arith.constant 0 : index
    %c0_7 = arith.constant 0 : index
    %6 = vector.load %arg3[%c0_5, %c0_6, %c0_7] : memref<1x8x32xf32, #tpu.memory_space<vmem>>, vector<1x8x32xf32>
    %7 = vector.shape_cast %6 : vector<1x8x32xf32> to vector<8x32xf32>
    %8 = arith.truncf %7 : vector<8x32xf32> to vector<8x32xbf16>
    %c0_8 = arith.constant 0 : index
    %c0_9 = arith.constant 0 : index
    %c0_10 = arith.constant 0 : index
    %9 = vector.load %arg4[%c0_8, %c0_9, %c0_10] : memref<1x1x8xi32, #tpu.memory_space<vmem>>, vector<1x1x8xi32>
    %10 = vector.shape_cast %9 : vector<1x1x8xi32> to vector<1x8xi32>
    %c0_i32 = arith.constant 0 : i32
    %11 = vector.broadcast %c0_i32 : i32 to vector<1x8xi32>
    %12 = arith.cmpi sgt, %10, %11 : vector<1x8xi32>
    %13 = tpu.iota {dimensions = array<i32: 0>} : vector<8x8xi32>
    %14 = tpu.iota {dimensions = array<i32: 1>} : vector<8x8xi32>
    %15 = arith.cmpi sgt, %14, %13 : vector<8x8xi32>
    %16 = vector.broadcast %12 : vector<1x8xi1> to vector<8x8xi1>
    %17 = arith.ori %16, %15 : vector<8x8xi1>
    %18 = vector.extract_strided_slice %2 {offsets = [0, 0], sizes = [8, 8], strides = [1, 1]} : vector<8x32xbf16> to vector<8x8xbf16>
    %19 = vector.extract_strided_slice %5 {offsets = [0, 0], sizes = [8, 8], strides = [1, 1]} : vector<8x32xbf16> to vector<8x8xbf16>
    %20 = vector.extract_strided_slice %8 {offsets = [0, 0], sizes = [8, 8], strides = [1, 1]} : vector<8x32xbf16> to vector<8x8xbf16>
    %cst = arith.constant dense<0.000000e+00> : vector<8x8xf32>
    %21 = tpu.matmul %18, %19, %cst {dimension_numbers = #tpu.dot_dimension_numbers<[1], [1], [0], [0], [0, 0, 1, 0], [], []>} : vector<8x8xbf16>, vector<8x8xbf16>, vector<8x8xf32> -> vector<8x8xf32>
    %cst_11 = arith.constant 0.353553385 : f32
    %22 = vector.broadcast %cst_11 : f32 to vector<8x8xf32>
    %23 = arith.mulf %21, %22 : vector<8x8xf32>
    %cst_12 = arith.constant -1.000000e+30 : f32
    %24 = vector.broadcast %cst_12 : f32 to vector<8x8xf32>
    %25 = arith.select %17, %24, %23 : vector<8x8xi1>, vector<8x8xf32>
    %cst_13 = arith.constant dense<0xFF800000> : vector<8xf32>
    %26 = vector.multi_reduction <maximumf>, %25, %cst_13 [1] : vector<8x8xf32> to vector<8xf32>
    %27 = vector.shape_cast %26 : vector<8xf32> to vector<8x1xf32>
    %28 = vector.broadcast %27 : vector<8x1xf32> to vector<8x8xf32>
    %29 = arith.subf %25, %28 : vector<8x8xf32>
    %30 = math.exp %29 : vector<8x8xf32>
    %cst_14 = arith.constant dense<0.000000e+00> : vector<8xf32>
    %31 = vector.multi_reduction <add>, %30, %cst_14 [1] : vector<8x8xf32> to vector<8xf32>
    %32 = vector.shape_cast %31 : vector<8xf32> to vector<8x1xf32>
    %33 = vector.broadcast %32 : vector<8x1xf32> to vector<8x8xf32>
    %34 = arith.divf %30, %33 : vector<8x8xf32>
    %c0_15 = arith.constant 0 : index
    %c0_16 = arith.constant 0 : index
    %c0_17 = arith.constant 0 : index
    %c0_18 = arith.constant 0 : index
    %35 = vector.load %arg6[%c0_15, %c0_16, %c0_17, %c0_18] : memref<1x4x8x8xf32, #tpu.memory_space<vmem>>, vector<1x1x8x8xf32>
    %36 = vector.shape_cast %35 : vector<1x1x8x8xf32> to vector<8x8xf32>
    %37 = vector.shape_cast %34 : vector<8x8xf32> to vector<1x1x8x8xf32>
    tpu.vector_store %arg6[%c0_15, %c0_16, %c0_17, %c0_18], %37 {strides = array<i32>} : memref<1x4x8x8xf32, #tpu.memory_space<vmem>>, vector<1x1x8x8xf32>,
    %38 = arith.truncf %34 : vector<8x8xf32> to vector<8x8xbf16>
    %cst_19 = arith.constant dense<0.000000e+00> : vector<8x8xf32>
    %39 = tpu.matmul %38, %20, %cst_19 {dimension_numbers = #tpu.dot_dimension_numbers<[1], [0], [0], [1], [0, 0, 1, 1], [], []>} : vector<8x8xbf16>, vector<8x8xbf16>, vector<8x8xf32> -> vector<8x8xf32>
    %40 = vector.extract_strided_slice %2 {offsets = [0, 8], sizes = [8, 8], strides = [1, 1]} : vector<8x32xbf16> to vector<8x8xbf16>
    %41 = vector.extract_strided_slice %5 {offsets = [0, 8], sizes = [8, 8], strides = [1, 1]} : vector<8x32xbf16> to vector<8x8xbf16>
    %42 = vector.extract_strided_slice %8 {offsets = [0, 8], sizes = [8, 8], strides = [1, 1]} : vector<8x32xbf16> to vector<8x8xbf16>
    %cst_20 = arith.constant dense<0.000000e+00> : vector<8x8xf32>
    %43 = tpu.matmul %40, %41, %cst_20 {dimension_numbers = #tpu.dot_dimension_numbers<[1], [1], [0], [0], [0, 0, 1, 0], [], []>} : vector<8x8xbf16>, vector<8x8xbf16>, vector<8x8xf32> -> vector<8x8xf32>
    %cst_21 = arith.constant 0.353553385 : f32
    %44 = vector.broadcast %cst_21 : f32 to vector<8x8xf32>
    %45 = arith.mulf %43, %44 : vector<8x8xf32>
    %cst_22 = arith.constant -1.000000e+30 : f32
    %46 = vector.broadcast %cst_22 : f32 to vector<8x8xf32>
    %47 = arith.select %17, %46, %45 : vector<8x8xi1>, vector<8x8xf32>
    %cst_23 = arith.constant dense<0xFF800000> : vector<8xf32>
    %48 = vector.multi_reduction <maximumf>, %47, %cst_23 [1] : vector<8x8xf32> to vector<8xf32>
    %49 = vector.shape_cast %48 : vector<8xf32> to vector<8x1xf32>
    %50 = vector.broadcast %49 : vector<8x1xf32> to vector<8x8xf32>
    %51 = arith.subf %47, %50 : vector<8x8xf32>
    %52 = math.exp %51 : vector<8x8xf32>
    %cst_24 = arith.constant dense<0.000000e+00> : vector<8xf32>
    %53 = vector.multi_reduction <add>, %52, %cst_24 [1] : vector<8x8xf32> to vector<8xf32>
    %54 = vector.shape_cast %53 : vector<8xf32> to vector<8x1xf32>
    %55 = vector.broadcast %54 : vector<8x1xf32> to vector<8x8xf32>
    %56 = arith.divf %52, %55 : vector<8x8xf32>
    %c0_25 = arith.constant 0 : index
    %c1 = arith.constant 1 : index
    %c0_26 = arith.constant 0 : index
    %c0_27 = arith.constant 0 : index
    %57 = vector.load %arg6[%c0_25, %c1, %c0_26, %c0_27] : memref<1x4x8x8xf32, #tpu.memory_space<vmem>>, vector<1x1x8x8xf32>
    %58 = vector.shape_cast %57 : vector<1x1x8x8xf32> to vector<8x8xf32>
    %59 = vector.shape_cast %56 : vector<8x8xf32> to vector<1x1x8x8xf32>
    tpu.vector_store %arg6[%c0_25, %c1, %c0_26, %c0_27], %59 {strides = array<i32>} : memref<1x4x8x8xf32, #tpu.memory_space<vmem>>, vector<1x1x8x8xf32>,
    %60 = arith.truncf %56 : vector<8x8xf32> to vector<8x8xbf16>
    %cst_28 = arith.constant dense<0.000000e+00> : vector<8x8xf32>
    %61 = tpu.matmul %60, %42, %cst_28 {dimension_numbers = #tpu.dot_dimension_numbers<[1], [0], [0], [1], [0, 0, 1, 1], [], []>} : vector<8x8xbf16>, vector<8x8xbf16>, vector<8x8xf32> -> vector<8x8xf32>
    %62 = vector.extract_strided_slice %2 {offsets = [0, 16], sizes = [8, 8], strides = [1, 1]} : vector<8x32xbf16> to vector<8x8xbf16>
    %63 = vector.extract_strided_slice %5 {offsets = [0, 16], sizes = [8, 8], strides = [1, 1]} : vector<8x32xbf16> to vector<8x8xbf16>
    %64 = vector.extract_strided_slice %8 {offsets = [0, 16], sizes = [8, 8], strides = [1, 1]} : vector<8x32xbf16> to vector<8x8xbf16>
    %cst_29 = arith.constant dense<0.000000e+00> : vector<8x8xf32>
    %65 = tpu.matmul %62, %63, %cst_29 {dimension_numbers = #tpu.dot_dimension_numbers<[1], [1], [0], [0], [0, 0, 1, 0], [], []>} : vector<8x8xbf16>, vector<8x8xbf16>, vector<8x8xf32> -> vector<8x8xf32>
    %cst_30 = arith.constant 0.353553385 : f32
    %66 = vector.broadcast %cst_30 : f32 to vector<8x8xf32>
    %67 = arith.mulf %65, %66 : vector<8x8xf32>
    %cst_31 = arith.constant -1.000000e+30 : f32
    %68 = vector.broadcast %cst_31 : f32 to vector<8x8xf32>
    %69 = arith.select %17, %68, %67 : vector<8x8xi1>, vector<8x8xf32>
    %cst_32 = arith.constant dense<0xFF800000> : vector<8xf32>
    %70 = vector.multi_reduction <maximumf>, %69, %cst_32 [1] : vector<8x8xf32> to vector<8xf32>
    %71 = vector.shape_cast %70 : vector<8xf32> to vector<8x1xf32>
    %72 = vector.broadcast %71 : vector<8x1xf32> to vector<8x8xf32>
    %73 = arith.subf %69, %72 : vector<8x8xf32>
    %74 = math.exp %73 : vector<8x8xf32>
    %cst_33 = arith.constant dense<0.000000e+00> : vector<8xf32>
    %75 = vector.multi_reduction <add>, %74, %cst_33 [1] : vector<8x8xf32> to vector<8xf32>
    %76 = vector.shape_cast %75 : vector<8xf32> to vector<8x1xf32>
    %77 = vector.broadcast %76 : vector<8x1xf32> to vector<8x8xf32>
    %78 = arith.divf %74, %77 : vector<8x8xf32>
    %c0_34 = arith.constant 0 : index
    %c2 = arith.constant 2 : index
    %c0_35 = arith.constant 0 : index
    %c0_36 = arith.constant 0 : index
    %79 = vector.load %arg6[%c0_34, %c2, %c0_35, %c0_36] : memref<1x4x8x8xf32, #tpu.memory_space<vmem>>, vector<1x1x8x8xf32>
    %80 = vector.shape_cast %79 : vector<1x1x8x8xf32> to vector<8x8xf32>
    %81 = vector.shape_cast %78 : vector<8x8xf32> to vector<1x1x8x8xf32>
    tpu.vector_store %arg6[%c0_34, %c2, %c0_35, %c0_36], %81 {strides = array<i32>} : memref<1x4x8x8xf32, #tpu.memory_space<vmem>>, vector<1x1x8x8xf32>,
    %82 = arith.truncf %78 : vector<8x8xf32> to vector<8x8xbf16>
    %cst_37 = arith.constant dense<0.000000e+00> : vector<8x8xf32>
    %83 = tpu.matmul %82, %64, %cst_37 {dimension_numbers = #tpu.dot_dimension_numbers<[1], [0], [0], [1], [0, 0, 1, 1], [], []>} : vector<8x8xbf16>, vector<8x8xbf16>, vector<8x8xf32> -> vector<8x8xf32>
    %84 = vector.extract_strided_slice %2 {offsets = [0, 24], sizes = [8, 8], strides = [1, 1]} : vector<8x32xbf16> to vector<8x8xbf16>
    %85 = vector.extract_strided_slice %5 {offsets = [0, 24], sizes = [8, 8], strides = [1, 1]} : vector<8x32xbf16> to vector<8x8xbf16>
    %86 = vector.extract_strided_slice %8 {offsets = [0, 24], sizes = [8, 8], strides = [1, 1]} : vector<8x32xbf16> to vector<8x8xbf16>
    %cst_38 = arith.constant dense<0.000000e+00> : vector<8x8xf32>
    %87 = tpu.matmul %84, %85, %cst_38 {dimension_numbers = #tpu.dot_dimension_numbers<[1], [1], [0], [0], [0, 0, 1, 0], [], []>} : vector<8x8xbf16>, vector<8x8xbf16>, vector<8x8xf32> -> vector<8x8xf32>
    %cst_39 = arith.constant 0.353553385 : f32
    %88 = vector.broadcast %cst_39 : f32 to vector<8x8xf32>
    %89 = arith.mulf %87, %88 : vector<8x8xf32>
    %cst_40 = arith.constant -1.000000e+30 : f32
    %90 = vector.broadcast %cst_40 : f32 to vector<8x8xf32>
    %91 = arith.select %17, %90, %89 : vector<8x8xi1>, vector<8x8xf32>
    %cst_41 = arith.constant dense<0xFF800000> : vector<8xf32>
    %92 = vector.multi_reduction <maximumf>, %91, %cst_41 [1] : vector<8x8xf32> to vector<8xf32>
    %93 = vector.shape_cast %92 : vector<8xf32> to vector<8x1xf32>
    %94 = vector.broadcast %93 : vector<8x1xf32> to vector<8x8xf32>
    %95 = arith.subf %91, %94 : vector<8x8xf32>
    %96 = math.exp %95 : vector<8x8xf32>
    %cst_42 = arith.constant dense<0.000000e+00> : vector<8xf32>
    %97 = vector.multi_reduction <add>, %96, %cst_42 [1] : vector<8x8xf32> to vector<8xf32>
    %98 = vector.shape_cast %97 : vector<8xf32> to vector<8x1xf32>
    %99 = vector.broadcast %98 : vector<8x1xf32> to vector<8x8xf32>
    %100 = arith.divf %96, %99 : vector<8x8xf32>
    %c0_43 = arith.constant 0 : index
    %c3 = arith.constant 3 : index
    %c0_44 = arith.constant 0 : index
    %c0_45 = arith.constant 0 : index
    %101 = vector.load %arg6[%c0_43, %c3, %c0_44, %c0_45] : memref<1x4x8x8xf32, #tpu.memory_space<vmem>>, vector<1x1x8x8xf32>
    %102 = vector.shape_cast %101 : vector<1x1x8x8xf32> to vector<8x8xf32>
    %103 = vector.shape_cast %100 : vector<8x8xf32> to vector<1x1x8x8xf32>
    tpu.vector_store %arg6[%c0_43, %c3, %c0_44, %c0_45], %103 {strides = array<i32>} : memref<1x4x8x8xf32, #tpu.memory_space<vmem>>, vector<1x1x8x8xf32>,
    %104 = arith.truncf %100 : vector<8x8xf32> to vector<8x8xbf16>
    %cst_46 = arith.constant dense<0.000000e+00> : vector<8x8xf32>
    %105 = tpu.matmul %104, %86, %cst_46 {dimension_numbers = #tpu.dot_dimension_numbers<[1], [0], [0], [1], [0, 0, 1, 1], [], []>} : vector<8x8xbf16>, vector<8x8xbf16>, vector<8x8xf32> -> vector<8x8xf32>
    %106 = tpu.concatenate %39, %61, %83, %105 in 1 : vector<8x8xf32>, vector<8x8xf32>, vector<8x8xf32>, vector<8x8xf32> -> vector<8x32xf32>
    %c0_47 = arith.constant 0 : index
    %c0_48 = arith.constant 0 : index
    %c0_49 = arith.constant 0 : index
    %107 = vector.load %arg5[%c0_47, %c0_48, %c0_49] : memref<1x8x32xf32, #tpu.memory_space<vmem>>, vector<1x8x32xf32>
    %108 = vector.shape_cast %107 : vector<1x8x32xf32> to vector<8x32xf32>
    %109 = vector.shape_cast %106 : vector<8x32xf32> to vector<1x8x32xf32>
    tpu.vector_store %arg5[%c0_47, %c0_48, %c0_49], %109 {strides = array<i32>} : memref<1x8x32xf32, #tpu.memory_space<vmem>>, vector<1x8x32xf32>,
    return
  }
  func.func @transform_0(%arg0: i32) -> (i32, i32, i32) {
    %c0_i32 = arith.constant 0 : i32
    %c0_i32_0 = arith.constant 0 : i32
    %c0_i32_1 = arith.constant 0 : i32
    return %arg0, %c0_i32, %c0_i32_0 : i32, i32, i32
  }
  func.func @transform_1(%arg0: i32) -> (i32, i32, i32) {
    %c0_i32 = arith.constant 0 : i32
    %c0_i32_0 = arith.constant 0 : i32
    %c0_i32_1 = arith.constant 0 : i32
    return %arg0, %c0_i32, %c0_i32_0 : i32, i32, i32
  }
  func.func @transform_2(%arg0: i32) -> (i32, i32, i32) {
    %c0_i32 = arith.constant 0 : i32
    %c0_i32_0 = arith.constant 0 : i32
    %c0_i32_1 = arith.constant 0 : i32
    return %arg0, %c0_i32, %c0_i32_0 : i32, i32, i32
  }
  func.func @transform_3(%arg0: i32) -> (i32, i32, i32) {
    %c0_i32 = arith.constant 0 : i32
    %c0_i32_0 = arith.constant 0 : i32
    %c0_i32_1 = arith.constant 0 : i32
    return %arg0, %c0_i32, %c0_i32_0 : i32, i32, i32
  }
  func.func @transform_4(%arg0: i32) -> (i32, i32, i32) {
    %c0_i32 = arith.constant 0 : i32
    %c0_i32_0 = arith.constant 0 : i32
    %c0_i32_1 = arith.constant 0 : i32
    return %arg0, %c0_i32, %c0_i32_0 : i32, i32, i32
  }
  func.func @transform_5(%arg0: i32) -> (i32, i32, i32, i32) {
    %c0_i32 = arith.constant 0 : i32
    %c0_i32_0 = arith.constant 0 : i32
    %c0_i32_1 = arith.constant 0 : i32
    %c0_i32_2 = arith.constant 0 : i32
    return %arg0, %c0_i32, %c0_i32_0, %c0_i32_1 : i32, i32, i32, i32
  }
}

module attributes {stable_mosaic.version = 11 : i64} {
  func.func @_linear_softmax_kernel(%arg0: i32, %arg1: i32, %arg2: i32, %arg3: memref<16x32xf32, #tpu.memory_space<vmem>>, %arg4: memref<32x16xbf16, #tpu.memory_space<vmem>>, %arg5: memref<16x16xf32, #tpu.memory_space<vmem>>, %arg6: memref<16x1xf32, #tpu.memory_space<vmem>>, %arg7: memref<16x1xf32, #tpu.memory_space<vmem>>) attributes {dimension_semantics = [#tpu.dimension_semantics<parallel>, #tpu.dimension_semantics<arbitrary>, #tpu.dimension_semantics<arbitrary>], iteration_bounds = array<i64: 1, 2, 1>, scalar_prefetch = 0 : i64, scratch_operands = 2 : i64, tpu.core_type = #tpu.core_type<tc>, window_params = [{transform_indices = @transform_0, window_bounds = array<i64: 16, 32>}, {transform_indices = @transform_1, window_bounds = array<i64: 32, 16>}, {transform_indices = @transform_2, window_bounds = array<i64: 16, 16>}]} {
    %c0_i32 = arith.constant 0 : i32
    %0 = arith.cmpi eq, %arg1, %c0_i32 : i32
    %c0_i32_0 = arith.constant 0 : i32
    %1 = arith.cmpi eq, %arg2, %c0_i32_0 : i32
    %2 = arith.andi %0, %1 : i1
    %3 = arith.extui %2 : i1 to i32
    %c0_i32_1 = arith.constant 0 : i32
    %4 = arith.cmpi ne, %3, %c0_i32_1 : i32
    scf.if %4 {
      %cst_8 = arith.constant 0xFF800000 : f32
      %15 = vector.broadcast %cst_8 : f32 to vector<16x1xf32>
      %c0_9 = arith.constant 0 : index
      %c0_10 = arith.constant 0 : index
      %16 = vector.load %arg6[%c0_9, %c0_10] : memref<16x1xf32, #tpu.memory_space<vmem>>, vector<16x1xf32>
      tpu.vector_store %arg6[%c0_9, %c0_10], %15 {strides = array<i32>} : memref<16x1xf32, #tpu.memory_space<vmem>>, vector<16x1xf32>,
      %cst_11 = arith.constant 0.000000e+00 : f32
      %17 = vector.broadcast %cst_11 : f32 to vector<16x1xf32>
      %c0_12 = arith.constant 0 : index
      %c0_13 = arith.constant 0 : index
      %18 = vector.load %arg7[%c0_12, %c0_13] : memref<16x1xf32, #tpu.memory_space<vmem>>, vector<16x1xf32>
      tpu.vector_store %arg7[%c0_12, %c0_13], %17 {strides = array<i32>} : memref<16x1xf32, #tpu.memory_space<vmem>>, vector<16x1xf32>,
    } else {
    }
    %c0 = arith.constant 0 : index
    %c0_2 = arith.constant 0 : index
    %5 = vector.load %arg3[%c0, %c0_2] : memref<16x32xf32, #tpu.memory_space<vmem>>, vector<16x32xf32>
    %6 = arith.truncf %5 : vector<16x32xf32> to vector<16x32xbf16>
    %c0_3 = arith.constant 0 : index
    %c0_4 = arith.constant 0 : index
    %7 = vector.load %arg4[%c0_3, %c0_4] : memref<32x16xbf16, #tpu.memory_space<vmem>>, vector<32x16xbf16>
    %cst = arith.constant dense<0.000000e+00> : vector<16x16xf32>
    %8 = tpu.matmul %6, %7, %cst {dimension_numbers = #tpu.dot_dimension_numbers<[1], [0], [0], [1], [0, 0, 1, 1], [], []>} : vector<16x32xbf16>, vector<32x16xbf16>, vector<16x16xf32> -> vector<16x16xf32>
    %c0_i32_5 = arith.constant 0 : i32
    %9 = arith.cmpi eq, %arg1, %c0_i32_5 : i32
    %10 = arith.extui %9 : i1 to i32
    %c0_i32_6 = arith.constant 0 : i32
    %11 = arith.cmpi ne, %10, %c0_i32_6 : i32
    scf.if %11 {
      %c0_8 = arith.constant 0 : index
      %c0_9 = arith.constant 0 : index
      %15 = vector.load %arg6[%c0_8, %c0_9] : memref<16x1xf32, #tpu.memory_space<vmem>>, vector<16x1xf32>
      %cst_10 = arith.constant dense<0xFF800000> : vector<16xf32>
      %16 = vector.multi_reduction <maximumf>, %8, %cst_10 [1] : vector<16x16xf32> to vector<16xf32>
      %17 = vector.shape_cast %16 : vector<16xf32> to vector<16x1xf32>
      %18 = arith.maximumf %15, %17 : vector<16x1xf32>
      %c0_11 = arith.constant 0 : index
      %c0_12 = arith.constant 0 : index
      %19 = vector.load %arg7[%c0_11, %c0_12] : memref<16x1xf32, #tpu.memory_space<vmem>>, vector<16x1xf32>
      %20 = arith.subf %15, %18 : vector<16x1xf32>
      %21 = math.exp %20 : vector<16x1xf32>
      %22 = arith.mulf %19, %21 : vector<16x1xf32>
      %23 = vector.broadcast %18 : vector<16x1xf32> to vector<16x16xf32>
      %24 = arith.subf %8, %23 : vector<16x16xf32>
      %25 = math.exp %24 : vector<16x16xf32>
      %cst_13 = arith.constant dense<0.000000e+00> : vector<16xf32>
      %26 = vector.multi_reduction <add>, %25, %cst_13 [1] : vector<16x16xf32> to vector<16xf32>
      %27 = vector.shape_cast %26 : vector<16xf32> to vector<16x1xf32>
      %28 = arith.addf %22, %27 : vector<16x1xf32>
      %c0_14 = arith.constant 0 : index
      %c0_15 = arith.constant 0 : index
      %29 = vector.load %arg7[%c0_14, %c0_15] : memref<16x1xf32, #tpu.memory_space<vmem>>, vector<16x1xf32>
      tpu.vector_store %arg7[%c0_14, %c0_15], %28 {strides = array<i32>} : memref<16x1xf32, #tpu.memory_space<vmem>>, vector<16x1xf32>,
      %c0_16 = arith.constant 0 : index
      %c0_17 = arith.constant 0 : index
      %30 = vector.load %arg6[%c0_16, %c0_17] : memref<16x1xf32, #tpu.memory_space<vmem>>, vector<16x1xf32>
      tpu.vector_store %arg6[%c0_16, %c0_17], %18 {strides = array<i32>} : memref<16x1xf32, #tpu.memory_space<vmem>>, vector<16x1xf32>,
    } else {
    }
    %c1_i32 = arith.constant 1 : i32
    %12 = arith.cmpi eq, %arg1, %c1_i32 : i32
    %13 = arith.extui %12 : i1 to i32
    %c0_i32_7 = arith.constant 0 : i32
    %14 = arith.cmpi ne, %13, %c0_i32_7 : i32
    scf.if %14 {
      %c0_8 = arith.constant 0 : index
      %c0_9 = arith.constant 0 : index
      %15 = vector.load %arg6[%c0_8, %c0_9] : memref<16x1xf32, #tpu.memory_space<vmem>>, vector<16x1xf32>
      %16 = vector.broadcast %15 : vector<16x1xf32> to vector<16x16xf32>
      %17 = arith.subf %8, %16 : vector<16x16xf32>
      %18 = math.exp %17 : vector<16x16xf32>
      %c0_10 = arith.constant 0 : index
      %c0_11 = arith.constant 0 : index
      %19 = vector.load %arg7[%c0_10, %c0_11] : memref<16x1xf32, #tpu.memory_space<vmem>>, vector<16x1xf32>
      %20 = vector.broadcast %19 : vector<16x1xf32> to vector<16x16xf32>
      %21 = arith.divf %18, %20 : vector<16x16xf32>
      %c0_12 = arith.constant 0 : index
      %c0_13 = arith.constant 0 : index
      %22 = vector.load %arg5[%c0_12, %c0_13] : memref<16x16xf32, #tpu.memory_space<vmem>>, vector<16x16xf32>
      tpu.vector_store %arg5[%c0_12, %c0_13], %21 {strides = array<i32>} : memref<16x16xf32, #tpu.memory_space<vmem>>, vector<16x16xf32>,
    } else {
    }
    return
  }
  func.func @transform_0(%arg0: i32, %arg1: i32, %arg2: i32) -> (i32, i32) {
    %c0_i32 = arith.constant 0 : i32
    %c0_i32_0 = arith.constant 0 : i32
    return %arg0, %c0_i32 : i32, i32
  }
  func.func @transform_1(%arg0: i32, %arg1: i32, %arg2: i32) -> (i32, i32) {
    %c0_i32 = arith.constant 0 : i32
    %c0_i32_0 = arith.constant 0 : i32
    return %c0_i32, %arg2 : i32, i32
  }
  func.func @transform_2(%arg0: i32, %arg1: i32, %arg2: i32) -> (i32, i32) {
    %0 = arith.muli %arg2, %arg1 : i32
    %c0_i32 = arith.constant 0 : i32
    return %arg0, %0 : i32, i32
  }
}

</mosaic_0001>

<bundles_post_ra>
// kernel: transformer_forward.25
= control target key start
LH: loop header
LB: loop body
LE: loop exit
PB: predicated region body
PF: predicated region fallthrough
CT: control target
= control target key end

     0   :  { %v112_v0 = vmov 0.0   ;;  %vm113_vm0 = vmmov 0   ;;  %vm41_vm1 = vcmask 261120   ;;  %vm86_vm2 = vcmask 785408   ;;  %s155_s1 = inlined_call_operand.vmem [shape: bf16[32,96], index: 1, kind: input, shape index: {}]   ;;  %s156_s0 = inlined_call_operand.vmem [shape: f32[16,32], index: 0, kind: input, shape index: {}]   ;;  %s157_s2 = inlined_call_operand.vmem [shape: f32[1,96], index: 2, kind: input, shape index: {}]   ;;  %s158_s3 = inlined_call_operand.vmem [shape: f32[16,96], index: 3, kind: output, shape index: {}]  }
   0x1   :  { %100 = vmatprep.subr.bf16.mxu0 %v112_v0  ;;  %v110_v1 = vld [vmem:[%s155_s1 + $0x8] sm:$0xff]   ;;  %104 = vmatprep.mubr.msk.bf16.mxu0 %vm113_vm0, %v112_v0  ;;  %v111_v2 = vld [vmem:[%s155_s1] sm:$0xff]  }
   0x2   :  { %101 = vmatpush3.bf16.msra.mxu0 %v110_v1  ;;  %v15_v3 = vld [vmem:[%s156_s0] sm:$0xff]  ;;  %v16_v4 = vld [vmem:[%s156_s0 + $0x8] sm:$0xff] }
   0x3   :  { %102 = vmatprep.subr.bf16.mxu0 %v112_v0  ;;  %v17_v5 = vpack.c.bf16 %v16_v4, %v15_v3  ;;  %v93_v6 = vld [vmem:[%s157_s2] ss:$0 sm:$0xff] }
   0x6   :  { %103 = vmatpush3.bf16.msra.mxu0 %v111_v2 }
   0x9   :  { %105 = vmatmul.mubr.msk.bf16.vlgmr.msra.gmra.mxu0 %vm41_vm1, %v17_v5 }
  0xc9   :  { %v79_v7 = vpop.f32.mrf.mxu0 }
  0xca   :  { %v80_v8 = vadd.f32 %v93_v6, %v79_v7 }
  0xcb   :  { %v106_v9 = vpop.f32.mrf.mxu0 }
  0xcc   :  { %87 = vst.msk [vmem:[%s158_s3] sm:$0xff] %vm86_vm2, %v80_v8 }
  0xcd   :  { %v82_v10 = vpop.f32.mrf.mxu0 }
  0xce   :  { %v83_v11 = vadd.f32 %v93_v6, %v82_v10 }
  0xcf   :  { %v107_v12 = vpop.f32.mrf.mxu0 }
  0xd0   :  { %88 = vst.msk [vmem:[%s158_s3 + $0x8] sm:$0xff] %vm86_vm2, %v83_v11 }

// kernel: transformer_forward.27
= control target key start
LH: loop header
LB: loop body
LE: loop exit
PB: predicated region body
PF: predicated region fallthrough
CT: control target
= control target key end

     0   :  { %v175_v0 = vmov 0.0   ;;  %vm176_vm0 = vmmov 0   ;;  %vm50_vm1 = vcmask 261120   ;;  %s252_s1 = inlined_call_operand.vmem [shape: bf16[32,32], index: 1, kind: input, shape index: {}]   ;;  %s253_s0 = inlined_call_operand.vmem [shape: f32[16,32], index: 0, kind: input, shape index: {}]   ;;  %s254_s2 = inlined_call_operand.vmem [shape: f32[1,32], index: 2, kind: input, shape index: {}]   ;;  %s255_s3 = inlined_call_operand.vmem [shape: f32[16,32], index: 3, kind: input, shape index: {}]   ;;  %s256_s4 = inlined_call_operand.vmem [shape: f32[1,32], index: 4, kind: input, shape index: {}]   ;;  %s257_s5 = inlined_call_operand.vmem [shape: f32[1,32], index: 5, kind: input, shape index: {}]   ;;  %s258_s6 = inlined_call_operand.vmem [shape: f32[16,32], index: 6, kind: output, shape index: {}]  }
   0x1   :  { %159 = vmatprep.subr.bf16.mxu0 %v175_v0  ;;  %v169_v1 = vld [vmem:[%s252_s1 + $0x8] sm:$0xff]   ;;  %163 = vmatprep.mubr.msk.bf16.mxu0 %vm176_vm0, %v175_v0  ;;  %v170_v2 = vld [vmem:[%s252_s1] sm:$0xff]  }
   0x2   :  { %160 = vmatpush3.bf16.msra.mxu0 %v169_v1  ;;  %v24_v3 = vld [vmem:[%s253_s0] sm:$0xff]  ;;  %v25_v4 = vld [vmem:[%s253_s0 + $0x8] sm:$0xff] }
   0x3   :  { %161 = vmatprep.subr.bf16.mxu0 %v175_v0  ;;  %v26_v5 = vpack.c.bf16 %v25_v4, %v24_v3  ;;  %v150_v6 = vld [vmem:[%s254_s2] ss:$0 sm:$0xff]  ;;  %v96_v13 = vld [vmem:[%s255_s3 + $0x8] sm:$0xff] }
   0x4   :  { %v95_v8 = vld [vmem:[%s255_s3] sm:$0xff] }
   0x5   :  { %v154_v36 = vld [vmem:[%s256_s4] ss:$0 sm:$0xff] }
   0x6   :  { %162 = vmatpush3.bf16.msra.mxu0 %v170_v2  ;;  %v155_v38 = vld [vmem:[%s257_s5] ss:$0 sm:$0xff] }
   0x9   :  { %164 = vmatmul.mubr.msk.bf16.vlgmr.msra.gmra.mxu0 %vm50_vm1, %v26_v5 }
  0xc9   :  { %v88_v7 = vpop.f32.mrf.mxu0 }
  0xca   :  { %v89_v9 = vadd.f32 %v150_v6, %v88_v7 }
  0xcb   :  { %v165_v10 = vpop.f32.mrf.mxu0 }
  0xcc   :  { %v97_v11 = vadd.f32 %v95_v8, %v89_v9 }
  0xcd   :  { %v91_v12 = vpop.f32.mrf.mxu0 }
  0xce   :  { %v92_v14 = vadd.f32 %v150_v6, %v91_v12  ;;  %v99_v15 = vsel %vm50_vm1, %v97_v11, 0.0 }
  0xcf   :  { %100 = vadd.xlane.f32.xlu0 %v99_v15  ;;  %v166_v16 = vpop.f32.mrf.mxu0 }
  0xd0   :  { %v98_v17 = vadd.f32 %v96_v13, %v92_v14 }
  0xd2   :  { %v102_v18 = vsel %vm50_vm1, %v98_v17, 0.0 }
  0xd3   :  { %103 = vadd.xlane.f32.xlu0 %v102_v18 }
 0x158   :  { %v101_v19 = vpop.xlane.xlu0 %100 }
 0x159   :  { %v106_v20 = vmul.f32 0.03125, %v101_v19 }
 0x15b   :  { %v108_v21 = vsub.f32 %v97_v11, %v106_v20 }
 0x15c   :  { %v104_v22 = vpop.xlane.xlu0 %103 }
 0x15d   :  { %v107_v23 = vmul.f32 0.03125, %v104_v22  ;;  %v110_v24 = vmul.f32 %v108_v21, %v108_v21 }
 0x15f   :  { %v109_v25 = vsub.f32 %v98_v17, %v107_v23  ;;  %v112_v26 = vsel %vm50_vm1, %v110_v24, 0.0 }
 0x160   :  { %113 = vadd.xlane.f32.xlu1 %v112_v26 }
 0x161   :  { %v111_v27 = vmul.f32 %v109_v25, %v109_v25 }
 0x163   :  { %v115_v28 = vsel %vm50_vm1, %v111_v27, 0.0 }
 0x164   :  { %116 = vadd.xlane.f32.xlu1 %v115_v28 }
 0x1e9   :  { %v114_v29 = vpop.xlane.xlu1 %113 }
 0x1ea   :  { %v118_v30 = vmul.f32 0.03125, %v114_v29 }
 0x1ec   :  { %v120_v31 = vadd.f32 1e-05, %v118_v30 }
 0x1ed   :  { %v117_v32 = vpop.xlane.xlu1 %116 }
 0x1ee   :  { %171 = vrsqrt.f32 %v120_v31  ;;  %v119_v33 = vmul.f32 0.03125, %v117_v32 }
 0x1f0   :  { %v121_v34 = vadd.f32 1e-05, %v119_v33 }
 0x1f2   :  { %173 = vrsqrt.f32 %v121_v34 }
 0x1fb   :  { %v172_v35 = vpop.eup %171 }
 0x1fc   :  { %v124_v37 = vmul.f32 %v172_v35, %v108_v21 }
 0x1fe   :  { %v133_v39 = vmul.f32 %v154_v36, %v124_v37 }
 0x1ff   :  { %v174_v40 = vpop.eup %173 }
 0x200   :  { %v142_v41 = vadd.f32 %v155_v38, %v133_v39  ;;  %v125_v42 = vmul.f32 %v174_v40, %v109_v25 }
 0x202   :  { %144 = vst.msk [vmem:[%s258_s6] sm:$0xff] %vm50_vm1, %v142_v41  ;;  %v134_v43 = vmul.f32 %v154_v36, %v125_v42 }
 0x204   :  { %v143_v44 = vadd.f32 %v155_v38, %v134_v43 }
 0x206   :  { %145 = vst.msk [vmem:[%s258_s6 + $0x8] sm:$0xff] %vm50_vm1, %v143_v44 }

// kernel: transformer_forward.28
= control target key start
LH: loop header
LB: loop body
LE: loop exit
PB: predicated region body
PF: predicated region fallthrough
CT: control target
= control target key end

     0   :  { %v290_v0 = vmov 0.0   ;;  %vm291_vm0 = vmmov 0   ;;  %vm53_vm1 = vcmask 261120   ;;  %vm140_vm2 = vcmask 523264   ;;  %s381_s1 = inlined_call_operand.vmem [shape: bf16[32,64], index: 1, kind: input, shape index: {}]   ;;  %s382_s0 = inlined_call_operand.vmem [shape: f32[16,32], index: 0, kind: input, shape index: {}]   ;;  %s383_s3 = inlined_call_operand.vmem [shape: bf16[64,32], index: 3, kind: input, shape index: {}]   ;;  %s384_s2 = inlined_call_operand.vmem [shape: f32[1,64], index: 2, kind: input, shape index: {}]   ;;  %s385_s4 = inlined_call_operand.vmem [shape: f32[1,32], index: 4, kind: input, shape index: {}]   ;;  %s386_s5 = inlined_call_operand.vmem [shape: f32[1,32], index: 5, kind: input, shape index: {}]   ;;  %s387_s6 = inlined_call_operand.vmem [shape: f32[1,32], index: 6, kind: input, shape index: {}]   ;;  %s388_s7 = inlined_call_operand.vmem [shape: f32[16,32], index: 7, kind: output, shape index: {}]  }
   0x1   :  { %258 = vmatprep.subr.bf16.mxu0 %v290_v0  ;;  %v280_v1 = vld [vmem:[%s381_s1 + $0x8] sm:$0xff]   ;;  %262 = vmatprep.mubr.msk.bf16.mxu0 %vm291_vm0, %v290_v0  ;;  %v281_v2 = vld [vmem:[%s381_s1] sm:$0xff]   ;;  %v282_v5 = vld [vmem:[%s383_s3 + $0x18] sm:$0xff]  }
   0x2   :  { %266 = vmatprep.subr.bf16.mxu1 %v290_v0  ;;  %274 = vmatprep.mubr.msk.bf16.mxu1 %vm291_vm0, %v290_v0  ;;  %v27_v3 = vld [vmem:[%s382_s0] sm:$0xff]  ;;  %v28_v4 = vld [vmem:[%s382_s0 + $0x8] sm:$0xff]  ;;  %v283_v7 = vld [vmem:[%s383_s3 + $0x10] sm:$0xff]  }
   0x3   :  { %259 = vmatpush3.bf16.msra.mxu0 %v280_v1  ;;  %v29_v6 = vpack.c.bf16 %v28_v4, %v27_v3  ;;  %267 = vmatpush3.bf16.msra.mxu1 %v282_v5  ;;  %v284_v8 = vld [vmem:[%s383_s3 + $0x8] sm:$0xff]   ;;  %v285_v9 = vld [vmem:[%s383_s3] sm:$0xff]  }
   0x4   :  { %260 = vmatprep.subr.bf16.mxu0 %v290_v0  ;;  %268 = vmatprep.subr.bf16.mxu1 %v290_v0  ;;  %v238_v10 = vld [vmem:[%s384_s2] ss:$0 sm:$0xff] }
   0x5   :  { %v242_v20 = vld [vmem:[%s385_s4] ss:$0 sm:$0xff] }
   0x6   :  { %v248_v48 = vld [vmem:[%s386_s5] ss:$0 sm:$0xff] }
   0x7   :  { %261 = vmatpush3.bf16.msra.mxu0 %v281_v2  ;;  %269 = vmatpush3.bf16.msra.mxu1 %v283_v7  ;;  %v249_v50 = vld [vmem:[%s387_s6] ss:$0 sm:$0xff] }
   0x8   :  { %270 = vmatprep.subr.bf16.mxu1 %v290_v0 }
   0xa   :  { %263 = vmatmul.mubr.msk.bf16.vlgmr.msra.gmra.mxu0 %vm53_vm1, %v29_v6 }
   0xb   :  { %271 = vmatpush3.bf16.msra.mxu1 %v284_v8 }
   0xc   :  { %272 = vmatprep.subr.bf16.mxu1 %v290_v0 }
   0xf   :  { %273 = vmatpush3.bf16.msra.mxu1 %v285_v9 }
  0xca   :  { %v91_v11 = vpop.f32.mrf.mxu0 }
  0xcb   :  { %v92_v13 = vadd.f32 %v238_v10, %v91_v11 }
  0xcc   :  { %v264_v12 = vpop.f32.mrf.mxu0 }
  0xcd   :  { %v98_v17 = vmax.f32 %v92_v13, 0.0 }
  0xce   :  { %v94_v14 = vpop.f32.mrf.mxu0 }
  0xcf   :  { %v95_v15 = vadd.f32 %v238_v10, %v94_v14 }
  0xd0   :  { %v265_v16 = vpop.f32.mrf.mxu0 }
  0xd1   :  { %v99_v18 = vmax.f32 %v95_v15, 0.0 }
  0xd3   :  { %v100_v19 = vpack.c.bf16 %v99_v18, %v98_v17 }
  0xd5   :  { %275 = vmatmul.mubr.msk.bf16.vlgmr.msra.gmra.mxu1 %vm140_vm2, %v100_v19 }
 0x195   :  { %v178_v21 = vpop.f32.mrf.mxu1 }
 0x196   :  { %v179_v22 = vadd.f32 %v242_v20, %v178_v21 }
 0x197   :  { %v276_v23 = vpop.f32.mrf.mxu1 }
 0x198   :  { %v185_v24 = vadd.f32 %v179_v22, %v27_v3 }
 0x199   :  { %v181_v25 = vpop.f32.mrf.mxu1 }
 0x19a   :  { %v182_v26 = vadd.f32 %v242_v20, %v181_v25  ;;  %v187_v27 = vsel %vm53_vm1, %v185_v24, 0.0 }
 0x19b   :  { %188 = vadd.xlane.f32.xlu0 %v187_v27  ;;  %v277_v28 = vpop.f32.mrf.mxu1 }
 0x19c   :  { %v186_v29 = vadd.f32 %v182_v26, %v28_v4 }
 0x19e   :  { %v190_v30 = vsel %vm53_vm1, %v186_v29, 0.0 }
 0x19f   :  { %191 = vadd.xlane.f32.xlu0 %v190_v30 }
 0x224   :  { %v189_v31 = vpop.xlane.xlu0 %188 }
 0x225   :  { %v194_v32 = vmul.f32 0.03125, %v189_v31 }
 0x227   :  { %v196_v33 = vsub.f32 %v185_v24, %v194_v32 }
 0x228   :  { %v192_v34 = vpop.xlane.xlu0 %191 }
 0x229   :  { %v195_v35 = vmul.f32 0.03125, %v192_v34  ;;  %v198_v36 = vmul.f32 %v196_v33, %v196_v33 }
 0x22b   :  { %v197_v37 = vsub.f32 %v186_v29, %v195_v35  ;;  %v200_v38 = vsel %vm53_vm1, %v198_v36, 0.0 }
 0x22c   :  { %201 = vadd.xlane.f32.xlu1 %v200_v38 }
 0x22d   :  { %v199_v39 = vmul.f32 %v197_v37, %v197_v37 }
 0x22f   :  { %v203_v40 = vsel %vm53_vm1, %v199_v39, 0.0 }
 0x230   :  { %204 = vadd.xlane.f32.xlu1 %v203_v40 }
 0x2b5   :  { %v202_v41 = vpop.xlane.xlu1 %201 }
 0x2b6   :  { %v206_v42 = vmul.f32 0.03125, %v202_v41 }
 0x2b8   :  { %v208_v43 = vadd.f32 1e-05, %v206_v42 }
 0x2b9   :  { %v205_v44 = vpop.xlane.xlu1 %204 }
 0x2ba   :  { %286 = vrsqrt.f32 %v208_v43  ;;  %v207_v45 = vmul.f32 0.03125, %v205_v44 }
 0x2bc   :  { %v209_v46 = vadd.f32 1e-05, %v207_v45 }
 0x2be   :  { %288 = vrsqrt.f32 %v209_v46 }
 0x2c7   :  { %v287_v47 = vpop.eup %286 }
 0x2c8   :  { %v212_v49 = vmul.f32 %v287_v47, %v196_v33 }
 0x2ca   :  { %v221_v51 = vmul.f32 %v248_v48, %v212_v49 }
 0x2cb   :  { %v289_v52 = vpop.eup %288 }
 0x2cc   :  { %v230_v53 = vadd.f32 %v249_v50, %v221_v51  ;;  %v213_v54 = vmul.f32 %v289_v52, %v197_v37 }
 0x2ce   :  { %232 = vst.msk [vmem:[%s388_s7] sm:$0xff] %vm53_vm1, %v230_v53  ;;  %v222_v55 = vmul.f32 %v248_v48, %v213_v54 }
 0x2d0   :  { %v231_v56 = vadd.f32 %v249_v50, %v222_v55 }
 0x2d2   :  { %233 = vst.msk [vmem:[%s388_s7 + $0x8] sm:$0xff] %vm53_vm1, %v231_v56 }

// kernel: transformer_forward.26
= control target key start
LH: loop header
LB: loop body
LE: loop exit
PB: predicated region body
PF: predicated region fallthrough
CT: control target
= control target key end

     0   :  { %11 = vsyncpa [#allocation3], 0  ;;  %s1380_s0 = inlined_call_operand.vmem [shape: f32[2,8,32], index: 0, kind: input, shape index: {}]   ;;  %s1381_s1 = inlined_call_operand.vmem [shape: f32[2,8,32], index: 1, kind: input, shape index: {}]   ;;  %s1382_s2 = inlined_call_operand.vmem [shape: f32[2,8,32], index: 2, kind: input, shape index: {}]   ;;  %s1383_s3 = inlined_call_operand.vmem [shape: s32[2,1,8], index: 3, kind: input, shape index: {}]   ;;  %s1384_s4 = inlined_call_operand.vmem [shape: f32[2,8,32], index: 4, kind: output, shape index: {0}]   ;;  %s1385_s5 = inlined_call_operand.hbm [shape: f32[2,4,8,8], index: 5, kind: output, shape index: {1}]  }
   0x1   :  { %13 = vsyncpa [#allocation3 + $0x1], 0  ;;  %s1165_s18 = smov 0   ;;  %s1167_s19 = smov 0  }
   0x2   :  { %s1169_s20 = smov 0   ;;  %s1171_s21 = smov 0  }
   0x3 LB: > { %s1186_s22 = sadd.s32 4294967295, %s1122_s21   ;;  %s907_s23 = sadd.s32 4294967294, %s1122_s21   ;;  %s1122_s21 = sphi %s1171_s21, %s1391_s21   ;;  %s1118_s20 = sphi %s1169_s20, %s1390_s20   ;;  %s1114_s19 = sphi %s1167_s19, %s1389_s19   ;;  %s1110_s18 = sphi %s1165_s18, %s1388_s18  }
   0x4   : > { %s1190_s24 = sadd.s32 1, %s1122_s21   ;;  %s156_s25 = sadd.s32 1, %s1118_s20 }
   0x5   : > { %s153_s26 = ssub.s32 %s1122_s21, %s1190_s24  ;;  %p166_p0 = scmp.ne.s32.totalorder %s1118_s20, %s1114_s19 }
   0x6   : > { %p154_p1 = scmp.eq.s32.totalorder %s153_s26, 0  ;;  %p167_p2 = scmp.eq.s32.totalorder %s1186_s22, 1 }
   0x7   : > { %p172_p3 = scmp.ne.s32.totalorder %s1114_s19, %s1110_s18  ;;  %p173_p4 = scmp.eq.s32.totalorder %s907_s23, 1 }
   0x8   : > { %s1201_s27 = scalar_select %p154_p1, %s1118_s20, %s156_s25  }
   0x9   : > { %p1203_p5 = por %p167_p2, %p166_p0  ;;  %p1207_p6 = por %p173_p4, %p172_p3 }
   0xa   : > { %p910_p7 = scmp.ge.s32.totalorder %s1122_s21, 1  ;;  %p218_p8 = scmp.lt.s32.totalorder %s1122_s21, 3 }
   0xc   : > { %p219_p9 = pnand %p910_p7, %p218_p8 }
   0xd   : > { %p260_p10 = scmp.lt.s32.totalorder (!%p219_p9), %s1186_s22, 1  ;;  %s1127_s16 = smov (!%p219_p9), 120  }
   0xe   : > { %222 = sbr.rel (%p219_p9) target bundleno = 1425 (0x591), region = 36  ;;  %s1128_s17 = smov (!%p219_p9), 112  }
   0xf   : > { %s1129_s23 = smov (!%p219_p9), 104   ;;  %s257_s7 = sand.u32 (!%p219_p9), 1, %s1114_s19  }
  0x10   : > { %s911_s8 = sshll.u32 (!%p219_p9), %s257_s7, 5  ;;  %s1130_s10 = smov (!%p219_p9), 8  }
  0x11   : > { %s1131_s11 = smov (!%p219_p9), 16  }
  0x13   : > { %v1124_v0 = vmov 0.0   ;;  %vm1125_vm0 = vmmov 0   ;;  %s261_s30 = scalar_select %p260_p10, %s1186_s22, 1  ;;  %vm288_vm1 = vcmask 64512   ;;  %v337_v6 = vlaneseq }
  0x14   : > { %949 = vmatprep.subr.bf16.mxu0 %v1124_v0  ;;  %951 = vmatprep.mubr.msk.bf16.mxu0 %vm1125_vm0, %v1124_v0  ;;  %v1126_v10 = vmov 0   ;;  %vm359_vm4 = vcmask 1043456  }
  0x15   : > { %955 = vmatprep.subr.bf16.mxu1 %v1124_v0  ;;  %957 = vmatprep.mubr.msk.bf16.mxu1 %vm1125_vm0, %v1124_v0  ;;  %s1221_s6 = sshll.u32 %s261_s30, 3  ;;  %s274_s15 = scalar_lea.vmem %s1383_s3, %s261_s30  ;;  %v338_v8 = vshrl.u32 %v337_v6, 7 }
  0x16   : > { %s267_s9 = scalar_lea.vmem %s1381_s1, %s1221_s6  ;;  %s263_s12 = scalar_lea.vmem %s1380_s0, %s1221_s6  ;;  %v286_v7 = vld [vmem:[%s274_s15] sm:$0x1] }
  0x17   : > { %v282_v1 = vld [vmem:[%s267_s9] sm:$0xff]  ;;  %vm287_vm2 = vcmp.gt.s32.totalorder %v286_v7, 0  ;;  %v339_v9 = vsub.s32 0, %v338_v8  ;;  %s271_s30 = scalar_lea.vmem %s1382_s2, %s1221_s6  ;;  %s1265_s9 = scalar_lea.vmem [#allocation2], %s911_s8 }
  0x18   : > { %v283_v2 = vpack.c.bf16 %v282_v1, %v282_v1  ;;  %v280_v4 = vld [vmem:[%s263_s12] sm:$0xff]  ;;  %v336_v11 = vsel %vm287_vm2, 1, %v1126_v10  ;;  %s932_s12 = sshll.u32 %s1186_s22, 9  ;;  %s788_s13 = sshll.u32 %s1265_s9, 4  ;;  %s1329_s13 = int_to_ptr.vmem [resolvable:$true] %s788_s13 }
  0x19   : > { %v281_v5 = vpack.c.bf16 %v280_v4, %v280_v4  ;;  %v1239_v12 = vrot.slane %v336_v11, %v339_v9  ;;  %v284_v25 = vld [vmem:[%s271_s30] sm:$0xff]  ;;  %s1132_s22 = smov [#allocation2]  }
  0x1a   : > { %v293_v3 = vsel %vm288_vm1, %v283_v2, 0  ;;  %407 = vrot.lane.b32.xlu1 %v283_v2, %s1127_s16  ;;  %v1255_v26 = vpack.c.bf16 %v284_v25, %v284_v25  ;;  %s1066_s25 = sshll.u32 %s1132_s22, 4  ;;  %s1067_s25 = int_to_ptr.vmem [resolvable:$false] %s1066_s25 }
  0x1b   : > { %950 = vmatpush3.bf16.xpose.msra.mxu0 %v293_v3  ;;  %vm341_vm3 = vcmp.eq.s32.totalorder %v1239_v12, 1  ;;  %s1068_s26 = scalar_lea.vmem %s1067_s25, 1024  ;;  %p1069_p0 = scmp.lt.s32.totalorder %s1329_s13, %s1067_s25 }
  0x1c   : > { %967 = vmatprep.subr.bf16.mxu0 %v1124_v0  ;;  %v361_v27 = vsel %vm359_vm4, %v1255_v26, 0 }
  0x1d   : > { %956 = vmatpush3.bf16.msra.mxu1 %v361_v27 }
  0x1e   : > { %404 = vrot.lane.b32.xlu1 %v281_v5, %s1127_s16  ;;  %961 = vmatprep.subr.bf16.mxu1 %v1124_v0 }
  0x22   : > { %952 = vmatmul.mubr.msk.bf16.vlgmr.msra.gmra.mxu0 %vm288_vm1, %v281_v5  ;;  %520 = vrot.lane.b32.xlu1 %v281_v5, %s1128_s17 }
  0x23   : > { %969 = vmatprep.mubr.msk.bf16.mxu0 %vm1125_vm0, %v1124_v0 }
  0x26   : > { %636 = vrot.lane.b32.xlu1 %v283_v2, %s1129_s23 }
  0x2a   : > { %634 = vrot.lane.b32.xlu1 %v281_v5, %s1129_s23 }
  0x8c   : > { %v408_v30 = vpop.permute.xlu1 %407 }
  0x8d   : > { %v413_v32 = vsel %vm288_vm1, %v408_v30, 0 }
  0x90   : > { %v405_v34 = vpop.permute.xlu1 %404 }
  0x94   : > { %v521_v36 = vpop.permute.xlu1 %520 }
  0x98   : > { %v637_v38 = vpop.permute.xlu1 %636 }
  0x99   : > { %v642_v39 = vsel %vm288_vm1, %v637_v38, 0 }
  0x9c   : > { %v635_v40 = vpop.permute.xlu1 %634 }
  0xe2   : > { %v329_v13 = vpop.f32.mrf.mxu0 }
  0xe3   : > { %v335_v14 = vmul.f32 0.35355338, %v329_v13 }
  0xe4   : > { %v953_v15 = vpop.f32.mrf.mxu0 }
  0xe5   : > { %v342_v16 = vsel %vm341_vm3, -1e+30, %v335_v14 }
  0xe6   : > { %v332_v17 = vpop.f32.mrf.mxu0  ;;  %v343_v18 = vsel %vm288_vm1, %v342_v16, -inf }
  0xe7   : > { %344 = vmax.xlane.f32.xlu0 %v343_v18 }
  0xe8   : > { %v954_v19 = vpop.f32.mrf.mxu0 }
 0x170   : > { %v345_v20 = vpop.xlane.xlu0 %344 }
 0x171   : > { %v346_v21 = vsub.f32 %v342_v16, %v345_v20 }
 0x173   : > { %v347_v22 = vmul.f32 1.442695, %v346_v21 }
 0x175   : > { %1046 = vpow2.f32 %v347_v22 }
 0x182   : > { %v1047_v23 = vpop.eup %1046 }
 0x183   : > { %v349_v24 = vsel %vm288_vm1, %v1047_v23, 0.0 }
 0x184   : > { %350 = vadd.xlane.f32.xlu0 %v349_v24 }
 0x19a   : > { %522 = vrot.lane.b32.xlu0 %v283_v2, %s1128_s17 }
 0x20d   : > { %v351_v28 = vpop.xlane.xlu0 %350 }
 0x20e   : > { %1048 = vrcp.f32 %v351_v28 }
 0x211   : > { %v523_v35 = vpop.permute.xlu0 %522 }
 0x212   : > { %v528_v37 = vsel %vm288_vm1, %v523_v35, 0 }
 0x21b   : > { %v1049_v29 = vpop.eup %1048 }
 0x21c   : > { %v353_v31 = vmul.f32 %v1049_v29, %v1047_v23 }
 0x21e   : > { %354 = vst.msk [vmem:[%s1265_s9] sm:$0xff] %vm288_vm1, %v353_v31  ;;  %v355_v33 = vpack.c.bf16 %v353_v31, %v353_v31 }
 0x220   : > { %958 = vmatmul.mubr.msk.bf16.vlgmr.msra.gmra.mxu1 %vm288_vm1, %v355_v33 }
 0x221   : > { %962 = vmatpush3.bf16.xpose.msra.mxu1 %v413_v32  ;;  %963 = vmatprep.mubr.msk.bf16.mxu1 %vm1125_vm0, %v1124_v0 }
 0x222   : > { %973 = vmatprep.subr.bf16.mxu1 %v1124_v0 }
 0x228   : > { %964 = vmatmul.mubr.msk.bf16.vlgmr.msra.gmra.mxu1 %vm288_vm1, %v405_v34 }
 0x229   : > { %974 = vmatpush3.bf16.xpose.msra.mxu1 %v528_v37  ;;  %975 = vmatprep.mubr.msk.bf16.mxu1 %vm1125_vm0, %v1124_v0 }
 0x22a   : > { %985 = vmatprep.subr.bf16.mxu1 %v1124_v0 }
 0x230   : > { %976 = vmatmul.mubr.msk.bf16.vlgmr.msra.gmra.mxu1 %vm288_vm1, %v521_v36 }
 0x231   : > { %986 = vmatpush3.bf16.xpose.msra.mxu1 %v642_v39  ;;  %987 = vmatprep.mubr.msk.bf16.mxu1 %vm1125_vm0, %v1124_v0 }
 0x238   : > { %988 = vmatmul.mubr.msk.bf16.vlgmr.msra.gmra.mxu1 %vm288_vm1, %v635_v40 }
 0x2e0   : > { %v1283_v41 = vpop.f32.mrf.mxu1 }
 0x2e2   : > { %v959_v42 = vpop.f32.mrf.mxu1 }
 0x2e4   : > { %v400_v43 = vpop.f32.mrf.mxu1 }
 0x2e6   : > { %v960_v44 = vpop.f32.mrf.mxu1 }
 0x2e8   : > { %v449_v45 = vpop.f32.mrf.mxu1 }
 0x2e9   : > { %v455_v46 = vmul.f32 0.35355338, %v449_v45 }
 0x2ea   : > { %v965_v47 = vpop.f32.mrf.mxu1 }
 0x2eb   : > { %v456_v48 = vsel %vm341_vm3, -1e+30, %v455_v46 }
 0x2ec   : > { %v452_v49 = vpop.f32.mrf.mxu1  ;;  %v457_v50 = vsel %vm288_vm1, %v456_v48, -inf }
 0x2ed   : > { %458 = vmax.xlane.f32.xlu1 %v457_v50 }
 0x2ee   : > { %v966_v51 = vpop.f32.mrf.mxu1 }
 0x2f0   : > { %v564_v52 = vpop.f32.mrf.mxu1 }
 0x2f1   : > { %v570_v53 = vmul.f32 0.35355338, %v564_v52 }
 0x2f2   : > { %v977_v54 = vpop.f32.mrf.mxu1 }
 0x2f3   : > { %v571_v55 = vsel %vm341_vm3, -1e+30, %v570_v53 }
 0x2f4   : > { %v567_v56 = vpop.f32.mrf.mxu1  ;;  %v572_v57 = vsel %vm288_vm1, %v571_v55, -inf }
 0x2f5   : > { %573 = vmax.xlane.f32.xlu0 %v572_v57 }
 0x2f6   : > { %v978_v58 = vpop.f32.mrf.mxu1 }
 0x2f8   : > { %v678_v59 = vpop.f32.mrf.mxu1 }
 0x2f9   : > { %v684_v60 = vmul.f32 0.35355338, %v678_v59 }
 0x2fa   : > { %v989_v61 = vpop.f32.mrf.mxu1 }
 0x2fb   : > { %v685_v62 = vsel %vm341_vm3, -1e+30, %v684_v60 }
 0x2fc   : > { %v686_v63 = vsel %vm288_vm1, %v685_v62, -inf  ;;  %v681_v1 = vpop.f32.mrf.mxu1 }
 0x2fd   : > { %687 = vmax.xlane.f32.xlu1 %v686_v63 }
 0x2fe   : > { %v990_v2 = vpop.f32.mrf.mxu1 }
 0x376   : > { %v459_v3 = vpop.xlane.xlu1 %458 }
 0x377   : > { %v460_v4 = vsub.f32 %v456_v48, %v459_v3 }
 0x379   : > { %v461_v5 = vmul.f32 1.442695, %v460_v4 }
 0x37b   : > { %1050 = vpow2.f32 %v461_v5 }
 0x37e   : > { %v574_v6 = vpop.xlane.xlu0 %573 }
 0x37f   : > { %v575_v7 = vsub.f32 %v571_v55, %v574_v6 }
 0x381   : > { %v576_v8 = vmul.f32 1.442695, %v575_v7 }
 0x383   : > { %1052 = vpow2.f32 %v576_v8 }
 0x386   : > { %v688_v13 = vpop.xlane.xlu1 %687 }
 0x387   : > { %v689_v14 = vsub.f32 %v685_v62, %v688_v13 }
 0x388   : > { %v1051_v9 = vpop.eup %1050 }
 0x389   : > { %v463_v10 = vsel %vm288_vm1, %v1051_v9, 0.0  ;;  %v690_v15 = vmul.f32 1.442695, %v689_v14 }
 0x38a   : > { %464 = vadd.xlane.f32.xlu1 %v463_v10 }
 0x38b   : > { %1054 = vpow2.f32 %v690_v15 }
 0x390   : > { %v1053_v11 = vpop.eup %1052 }
 0x391   : > { %v578_v12 = vsel %vm288_vm1, %v1053_v11, 0.0 }
 0x392   : > { %579 = vadd.xlane.f32.xlu0 %v578_v12 }
 0x398   : > { %v1055_v16 = vpop.eup %1054 }
 0x399   : > { %v692_v17 = vsel %vm288_vm1, %v1055_v16, 0.0 }
 0x39b   : > { %586 = vrot.lane.b32.xlu1 %v1255_v26, %s1128_s17  ;;  %s1333_s17 = scalar_lea.sflag [#allocation3], %s257_s7 }
 0x3a8   : > { %472 = vrot.lane.b32.xlu0 %v1255_v26, %s1127_s16  ;;  %s1327_s16 = scalar_lea.hbm %s1385_s5, %s932_s12 }
 0x3bf   : > { %693 = vadd.xlane.f32.xlu1 %v692_v17 }
 0x3d0   : > { %700 = vrot.lane.b32.xlu1 %v1255_v26, %s1129_s23  ;;  %s1062_s23 = scalar_lea.vmem %s1329_s13, 512 }
 0x3d1   : > { %p1063_p11 = scmp.ne.s32.totalorder %s1329_s13, %s1062_s23  ;;  %p1070_p1 = scmp.lt.s32.totalorder %s1068_s26, %s1062_s23 }
 0x3d3   : > { %p1064_p12 = pnand %p1063_p11, %p1203_p5  ;;  %p1071_p2 = por %p1070_p1, %p1069_p0 }
 0x3d5   : > { %p1065_p13 = pneg %p1064_p12 }
 0x3d7   : > { %p1072_p3 = pnand %p1071_p2, %p1065_p13 }
 0x413   : > { %v465_v18 = vpop.xlane.xlu1 %464 }
 0x414   : > { %1056 = vrcp.f32 %v465_v18 }
 0x417   : > { %v587_v24 = vpop.permute.xlu1 %586 }
 0x418   : > { %v592_v27 = vsel %vm359_vm4, %v587_v24, 0 }
 0x41b   : > { %v580_v19 = vpop.xlane.xlu0 %579 }
 0x41c   : > { %1058 = vrcp.f32 %v580_v19 }
 0x41f   : > { %v473_v20 = vpop.permute.xlu0 %472 }
 0x420   : > { %v478_v21 = vsel %vm359_vm4, %v473_v20, 0 }
 0x421   : > { %v1057_v22 = vpop.eup %1056  ;;  %968 = vmatpush3.bf16.msra.mxu0 %v478_v21 }
 0x422   : > { %979 = vmatprep.subr.bf16.mxu0 %v1124_v0  ;;  %v467_v23 = vmul.f32 %v1057_v22, %v1051_v9 }
 0x424   : > { %919 = vst.msk [vmem:[%s1265_s9 + $0x8] sm:$0xff] %vm288_vm1, %v467_v23  ;;  %v470_v25 = vpack.c.bf16 %v467_v23, %v467_v23 }
 0x426   : > { %970 = vmatmul.mubr.msk.bf16.vlgmr.msra.gmra.mxu0 %vm288_vm1, %v470_v25 }
 0x427   : > { %980 = vmatpush3.bf16.msra.mxu0 %v592_v27  ;;  %981 = vmatprep.mubr.msk.bf16.mxu0 %vm1125_vm0, %v1124_v0 }
 0x428   : > { %991 = vmatprep.subr.bf16.mxu0 %v1124_v0 }
 0x429   : > { %v1059_v26 = vpop.eup %1058 }
 0x42a   : > { %v582_v28 = vmul.f32 %v1059_v26, %v1053_v11 }
 0x42c   : > { %922 = vst.msk [vmem:[%s1265_s9 + $0x10] sm:$0xff] %vm288_vm1, %v582_v28  ;;  %v585_v29 = vpack.c.bf16 %v582_v28, %v582_v28 }
 0x42e   : > { %982 = vmatmul.mubr.msk.bf16.vlgmr.msra.gmra.mxu0 %vm288_vm1, %v585_v29 }
 0x42f   : > { %993 = vmatprep.mubr.msk.bf16.mxu0 %vm1125_vm0, %v1124_v0 }
 0x448   : > { %v694_v30 = vpop.xlane.xlu1 %693 }
 0x449   : > { %1060 = vrcp.f32 %v694_v30 }
 0x44c   : > { %v701_v31 = vpop.permute.xlu1 %700 }
 0x44d   : > { %v706_v32 = vsel %vm359_vm4, %v701_v31, 0 }
 0x44e   : > { %992 = vmatpush3.bf16.msra.mxu0 %v706_v32 }
 0x456   : > { %v1061_v33 = vpop.eup %1060 }
 0x457   : > { %v696_v34 = vmul.f32 %v1061_v33, %v1055_v16 }
 0x459   : > { %925 = vst.msk [vmem:[%s1265_s9 + $0x18] sm:$0xff] %vm288_vm1, %v696_v34  ;;  %v699_v35 = vpack.c.bf16 %v696_v34, %v696_v34 }
 0x45b   : > { %994 = vmatmul.mubr.msk.bf16.vlgmr.msra.gmra.mxu0 %vm288_vm1, %v699_v35 }
 0x4e6   : > { %v514_v36 = vpop.f32.mrf.mxu0 }
 0x4e7   : > { %749 = vrot.lane.b32.xlu0 %v514_v36, %s1130_s10 }
 0x4e8   : > { %v971_v0 = vpop.f32.mrf.mxu0 }
 0x4ea   : > { %v517_v37 = vpop.f32.mrf.mxu0 }
 0x4ec   : > { %v972_v38 = vpop.f32.mrf.mxu0 }
 0x4ee   : > { %v628_v39 = vpop.f32.mrf.mxu0 }
 0x4ef   : > { %753 = vrot.lane.b32.xlu1 %v628_v39, %s1131_s11 }
 0x4f0   : > { %v983_v40 = vpop.f32.mrf.mxu0 }
 0x4f2   : > { %v631_v42 = vpop.f32.mrf.mxu0 }
 0x4f4   : > { %v984_v43 = vpop.f32.mrf.mxu0 }
 0x4f5   : > { %1075 = shalt.err (!%p1072_p3)
}
 0x4f6   : > { %s1076_s30 = scalar_lea.hbm %s1327_s16, 512  ;;  %s1080_s9 = scalar_lea.hbm %s1385_s5, 1024 }
 0x4f7   : > { %p1077_p4 = scmp.ne.s32.totalorder %s1327_s16, %s1076_s30  ;;  %p1081_p9 = scmp.lt.s32.totalorder %s1327_s16, %s1385_s5 }
 0x4f8   : > { %p1082_p10 = scmp.lt.s32.totalorder %s1080_s9, %s1076_s30 }
 0x4f9   : > { %p1078_p7 = pnand %p1077_p4, %p1203_p5 }
 0x4fa   : > { %p1083_p11 = por %p1082_p10, %p1081_p9 }
 0x4fb   : > { %p1079_p8 = pneg %p1078_p7 }
 0x4fd   : > { %p1084_p12 = pnand %p1083_p11, %p1079_p8 }
 0x4ff   : > { %1087 = shalt.err (!%p1084_p12)
}
 0x500   : > { %s1133_s14 = smov 128   ;;  %s1134_s15 = smov 24   ;;  %vm761_vm5 = vcmask 130048   ;;  %vm763_vm6 = vcmask 195584   ;;  %vm765_vm7 = vcmask 261120  }
 0x501   : > { %997 = dma.vmem_to_hbm [thread:$0]  (%p1203_p5), %s1329_s13, 512, %s1327_s16, %s1333_s17, %s1133_s14, %s1133_s14, %s1130_s10  }
 0x502   : > { %s278_s22 = scalar_lea.vmem %s1384_s4, %s1221_s6 }
 0x51b   : > { %v742_v44 = vpop.f32.mrf.mxu0 }
 0x51c   : > { %757 = vrot.lane.b32.xlu0 %v742_v44, %s1134_s15 }
 0x51d   : > { %v995_v45 = vpop.f32.mrf.mxu0 }
 0x51f   : > { %v745_v46 = vpop.f32.mrf.mxu0 }
 0x521   : > { %v996_v47 = vpop.f32.mrf.mxu0 }
 0x559   : > { %v750_v48 = vpop.permute.xlu0 %749 }
 0x55a   : > { %v760_v50 = vsel %vm288_vm1, %v1283_v41, %v750_v48 }
 0x561   : > { %v754_v49 = vpop.permute.xlu1 %753 }
 0x562   : > { %v762_v51 = vsel %vm761_vm5, %v760_v50, %v754_v49 }
 0x58e   : > { %v758_v52 = vpop.permute.xlu0 %757 }
 0x58f   : > { %v764_v53 = vsel %vm763_vm6, %v762_v51, %v758_v52 }
 0x590   : > { %766 = vst.msk [vmem:[%s278_s22] sm:$0xff] %vm765_vm7, %v764_v53 }
 0x591 PF: > { %p1003_p5 = scmp.ge.s32.totalorder %s1122_s21, 2  ;;  %s810_s10 = sand.u32 1, %s1110_s18  }
 0x592   : > { %s811_s13 = scalar_lea.sflag [#allocation3], %s810_s10 }
 0x593   : > { %p1000_p13 = pnand %p1003_p5, %p1207_p6 }
 0x595   : > { %p1001_p0 = pneg %p1000_p13 }
 0x597   : > { %1105 = dma.done.wait (%p1001_p0), %s811_s13, 512  }
 0x598   : > { %1107 = vsyncadd (%p1001_p0), %s811_s13, 4294966784  ;;  %p16_p1 = scmp.ge.s32.totalorder %s1190_s24, 4   ;;  %s1388_s18 = smov %s1114_s19 }
 0x599   : > { %s1389_s19 = smov %s1118_s20  ;;  %s1390_s20 = smov %s1201_s27 }
 0x59a   : > { %s1391_s21 = smov %s1190_s24  ;;  %18 = sbr.rel (!%p16_p1) target bundleno = 3 (0x3), region = 95 }
 0x59f   :  { %816 = vsyncpa [#allocation3], 1 }
 0x5a0   :  { %818 = vsyncpa [#allocation3 + $0x1], 1 }

// kernel: transformer_forward.37
= control target key start
LH: loop header
LB: loop body
LE: loop exit
PB: predicated region body
PF: predicated region fallthrough
CT: control target
= control target key end

     0   :  { %v112_v0 = vmov 0.0   ;;  %vm113_vm0 = vmmov 0   ;;  %vm41_vm1 = vcmask 261120   ;;  %vm86_vm2 = vcmask 523264   ;;  %s155_s1 = inlined_call_operand.vmem [shape: bf16[32,64], index: 1, kind: input, shape index: {}]   ;;  %s156_s0 = inlined_call_operand.vmem [shape: f32[16,32], index: 0, kind: input, shape index: {}]   ;;  %s157_s2 = inlined_call_operand.vmem [shape: f32[1,64], index: 2, kind: input, shape index: {}]   ;;  %s158_s3 = inlined_call_operand.vmem [shape: f32[16,64], index: 3, kind: output, shape index: {}]  }
   0x1   :  { %100 = vmatprep.subr.bf16.mxu0 %v112_v0  ;;  %v110_v1 = vld [vmem:[%s155_s1 + $0x8] sm:$0xff]   ;;  %104 = vmatprep.mubr.msk.bf16.mxu0 %vm113_vm0, %v112_v0  ;;  %v111_v2 = vld [vmem:[%s155_s1] sm:$0xff]  }
   0x2   :  { %101 = vmatpush3.bf16.msra.mxu0 %v110_v1  ;;  %v15_v3 = vld [vmem:[%s156_s0] sm:$0xff]  ;;  %v16_v4 = vld [vmem:[%s156_s0 + $0x8] sm:$0xff] }
   0x3   :  { %102 = vmatprep.subr.bf16.mxu0 %v112_v0  ;;  %v17_v5 = vpack.c.bf16 %v16_v4, %v15_v3  ;;  %v93_v6 = vld [vmem:[%s157_s2] ss:$0 sm:$0xff] }
   0x6   :  { %103 = vmatpush3.bf16.msra.mxu0 %v111_v2 }
   0x9   :  { %105 = vmatmul.mubr.msk.bf16.vlgmr.msra.gmra.mxu0 %vm41_vm1, %v17_v5 }
  0xc9   :  { %v79_v7 = vpop.f32.mrf.mxu0 }
  0xca   :  { %v80_v8 = vadd.f32 %v93_v6, %v79_v7 }
  0xcb   :  { %v106_v9 = vpop.f32.mrf.mxu0 }
  0xcc   :  { %87 = vst.msk [vmem:[%s158_s3] sm:$0xff] %vm86_vm2, %v80_v8 }
  0xcd   :  { %v82_v10 = vpop.f32.mrf.mxu0 }
  0xce   :  { %v83_v11 = vadd.f32 %v93_v6, %v82_v10 }
  0xcf   :  { %v107_v12 = vpop.f32.mrf.mxu0 }
  0xd0   :  { %88 = vst.msk [vmem:[%s158_s3 + $0x8] sm:$0xff] %vm86_vm2, %v83_v11 }

// kernel: transformer_forward.36
= control target key start
LH: loop header
LB: loop body
LE: loop exit
PB: predicated region body
PF: predicated region fallthrough
CT: control target
= control target key end

     0   :  { %v111_v0 = vmov 0.0   ;;  %vm112_vm0 = vmmov 0   ;;  %vm41_vm1 = vcmask 261120   ;;  %s154_s1 = inlined_call_operand.vmem [shape: bf16[32,32], index: 1, kind: input, shape index: {}]   ;;  %s155_s0 = inlined_call_operand.vmem [shape: f32[16,32], index: 0, kind: input, shape index: {}]   ;;  %s156_s2 = inlined_call_operand.vmem [shape: f32[1,32], index: 2, kind: input, shape index: {}]   ;;  %s157_s3 = inlined_call_operand.vmem [shape: f32[16,32], index: 3, kind: output, shape index: {}]  }
   0x1   :  { %99 = vmatprep.subr.bf16.mxu0 %v111_v0  ;;  %v109_v1 = vld [vmem:[%s154_s1 + $0x8] sm:$0xff]   ;;  %103 = vmatprep.mubr.msk.bf16.mxu0 %vm112_vm0, %v111_v0  ;;  %v110_v2 = vld [vmem:[%s154_s1] sm:$0xff]  }
   0x2   :  { %100 = vmatpush3.bf16.msra.mxu0 %v109_v1  ;;  %v15_v3 = vld [vmem:[%s155_s0] sm:$0xff]  ;;  %v16_v4 = vld [vmem:[%s155_s0 + $0x8] sm:$0xff] }
   0x3   :  { %101 = vmatprep.subr.bf16.mxu0 %v111_v0  ;;  %v17_v5 = vpack.c.bf16 %v16_v4, %v15_v3  ;;  %v92_v6 = vld [vmem:[%s156_s2] ss:$0 sm:$0xff] }
   0x6   :  { %102 = vmatpush3.bf16.msra.mxu0 %v110_v2 }
   0x9   :  { %104 = vmatmul.mubr.msk.bf16.vlgmr.msra.gmra.mxu0 %vm41_vm1, %v17_v5 }
  0xc9   :  { %v79_v7 = vpop.f32.mrf.mxu0 }
  0xca   :  { %v80_v8 = vadd.f32 %v92_v6, %v79_v7 }
  0xcb   :  { %v105_v9 = vpop.f32.mrf.mxu0 }
  0xcc   :  { %86 = vst.msk [vmem:[%s157_s3] sm:$0xff] %vm41_vm1, %v80_v8 }
  0xcd   :  { %v82_v10 = vpop.f32.mrf.mxu0 }
  0xce   :  { %v83_v11 = vadd.f32 %v92_v6, %v82_v10 }
  0xcf   :  { %v106_v12 = vpop.f32.mrf.mxu0 }
  0xd0   :  { %87 = vst.msk [vmem:[%s157_s3 + $0x8] sm:$0xff] %vm41_vm1, %v83_v11 }

// kernel: transformer_forward.34
= control target key start
LH: loop header
LB: loop body
LE: loop exit
PB: predicated region body
PF: predicated region fallthrough
CT: control target
= control target key end

     0   :  { %11 = vsyncpa [#allocation3], 0  ;;  %s1387_s0 = inlined_call_operand.vmem [shape: f32[2,8,32], index: 0, kind: input, shape index: {}]   ;;  %s1388_s1 = inlined_call_operand.vmem [shape: f32[2,8,32], index: 1, kind: input, shape index: {}]   ;;  %s1389_s2 = inlined_call_operand.vmem [shape: f32[2,8,32], index: 2, kind: input, shape index: {}]   ;;  %s1390_s3 = inlined_call_operand.vmem [shape: s32[2,1,8], index: 3, kind: input, shape index: {}]   ;;  %s1391_s4 = inlined_call_operand.vmem [shape: f32[2,8,32], index: 4, kind: output, shape index: {0}]   ;;  %s1392_s5 = inlined_call_operand.hbm [shape: f32[2,4,8,8], index: 5, kind: output, shape index: {1}]  }
   0x1   :  { %13 = vsyncpa [#allocation3 + $0x1], 0  ;;  %s1171_s18 = smov 0   ;;  %s1173_s19 = smov 0  }
   0x2   :  { %s1175_s20 = smov 0   ;;  %s1177_s21 = smov 0  }
   0x3 LB: > { %s1192_s22 = sadd.s32 4294967295, %s1128_s21   ;;  %s913_s23 = sadd.s32 4294967294, %s1128_s21   ;;  %s1128_s21 = sphi %s1177_s21, %s1400_s21   ;;  %s1124_s20 = sphi %s1175_s20, %s1399_s20   ;;  %s1120_s19 = sphi %s1173_s19, %s1398_s19   ;;  %s1116_s18 = sphi %s1171_s18, %s1397_s18  }
   0x4   : > { %s1196_s24 = sadd.s32 1, %s1128_s21   ;;  %s156_s25 = sadd.s32 1, %s1124_s20 }
   0x5   : > { %s153_s26 = ssub.s32 %s1128_s21, %s1196_s24  ;;  %p166_p0 = scmp.ne.s32.totalorder %s1124_s20, %s1120_s19 }
   0x6   : > { %p154_p1 = scmp.eq.s32.totalorder %s153_s26, 0  ;;  %p167_p2 = scmp.eq.s32.totalorder %s1192_s22, 1 }
   0x7   : > { %p172_p3 = scmp.ne.s32.totalorder %s1120_s19, %s1116_s18  ;;  %p173_p4 = scmp.eq.s32.totalorder %s913_s23, 1 }
   0x8   : > { %s1207_s27 = scalar_select %p154_p1, %s1124_s20, %s156_s25  }
   0x9   : > { %p1209_p5 = por %p167_p2, %p166_p0  ;;  %p1213_p6 = por %p173_p4, %p172_p3 }
   0xa   : > { %p916_p7 = scmp.ge.s32.totalorder %s1128_s21, 1  ;;  %p218_p8 = scmp.lt.s32.totalorder %s1128_s21, 3 }
   0xc   : > { %p219_p9 = pnand %p916_p7, %p218_p8 }
   0xd   : > { %p260_p10 = scmp.lt.s32.totalorder (!%p219_p9), %s1192_s22, 1  ;;  %s1133_s16 = smov (!%p219_p9), 120  }
   0xe   : > { %222 = sbr.rel (%p219_p9) target bundleno = 1425 (0x591), region = 36  ;;  %s1134_s17 = smov (!%p219_p9), 112  }
   0xf   : > { %s1135_s23 = smov (!%p219_p9), 104   ;;  %s257_s7 = sand.u32 (!%p219_p9), 1, %s1120_s19  }
  0x10   : > { %s917_s8 = sshll.u32 (!%p219_p9), %s257_s7, 5  ;;  %s1136_s10 = smov (!%p219_p9), 8  }
  0x11   : > { %s1137_s11 = smov (!%p219_p9), 16  }
  0x13   : > { %v1130_v0 = vmov 0.0   ;;  %vm1131_vm0 = vmmov 0   ;;  %s261_s30 = scalar_select %p260_p10, %s1192_s22, 1  ;;  %vm300_vm1 = vcmask 64512   ;;  %v288_v6 = vlaneseq }
  0x14   : > { %955 = vmatprep.subr.bf16.mxu0 %v1130_v0  ;;  %957 = vmatprep.mubr.msk.bf16.mxu0 %vm1131_vm0, %v1130_v0  ;;  %v1132_v10 = vmov 0   ;;  %vm365_vm6 = vcmask 1043456  }
  0x15   : > { %961 = vmatprep.subr.bf16.mxu1 %v1130_v0  ;;  %963 = vmatprep.mubr.msk.bf16.mxu1 %vm1131_vm0, %v1130_v0  ;;  %s1227_s6 = sshll.u32 %s261_s30, 3  ;;  %s274_s15 = scalar_lea.vmem %s1390_s3, %s261_s30  ;;  %v289_v8 = vshrl.u32 %v288_v6, 7  ;;  %v291_v12 = vand.u32 127, %v288_v6 }
  0x16   : > { %s267_s9 = scalar_lea.vmem %s1388_s1, %s1227_s6  ;;  %s263_s12 = scalar_lea.vmem %s1387_s0, %s1227_s6  ;;  %v286_v7 = vld [vmem:[%s274_s15] sm:$0x1] }
  0x17   : > { %v282_v1 = vld [vmem:[%s267_s9] sm:$0xff]  ;;  %vm287_vm2 = vcmp.gt.s32.totalorder %v286_v7, 0  ;;  %v296_v9 = vsub.s32 0, %v289_v8  ;;  %vm292_vm3 = vcmp.gt.s32.totalorder %v291_v12, %v289_v8  ;;  %s271_s30 = scalar_lea.vmem %s1389_s2, %s1227_s6  ;;  %s1272_s9 = scalar_lea.vmem [#allocation2], %s917_s8 }
  0x18   : > { %v283_v2 = vpack.c.bf16 %v282_v1, %v282_v1  ;;  %v280_v4 = vld [vmem:[%s263_s12] sm:$0xff]  ;;  %v293_v11 = vsel %vm287_vm2, 1, %v1132_v10  ;;  %s938_s12 = sshll.u32 %s1192_s22, 9  ;;  %s794_s13 = sshll.u32 %s1272_s9, 4  ;;  %s1336_s13 = int_to_ptr.vmem [resolvable:$true] %s794_s13 }
  0x19   : > { %v281_v5 = vpack.c.bf16 %v280_v4, %v280_v4  ;;  %v297_v13 = vrot.slane %v293_v11, %v296_v9  ;;  %v284_v27 = vld [vmem:[%s271_s30] sm:$0xff]  ;;  %s1138_s22 = smov [#allocation2]  }
  0x1a   : > { %v305_v3 = vsel %vm300_vm1, %v283_v2, 0  ;;  %413 = vrot.lane.b32.xlu1 %v283_v2, %s1133_s16  ;;  %v1262_v28 = vpack.c.bf16 %v284_v27, %v284_v27  ;;  %s1072_s25 = sshll.u32 %s1138_s22, 4  ;;  %s1073_s25 = int_to_ptr.vmem [resolvable:$false] %s1072_s25 }
  0x1b   : > { %956 = vmatpush3.bf16.xpose.msra.mxu0 %v305_v3  ;;  %vm298_vm4 = vcmp.eq.s32.totalorder %v297_v13, 1  ;;  %s1074_s26 = scalar_lea.vmem %s1073_s25, 1024  ;;  %p1075_p0 = scmp.lt.s32.totalorder %s1336_s13, %s1073_s25 }
  0x1c   : > { %973 = vmatprep.subr.bf16.mxu0 %v1130_v0  ;;  %vm1245_vm5 = vmor %vm298_vm4, %vm292_vm3  ;;  %v367_v29 = vsel %vm365_vm6, %v1262_v28, 0 }
  0x1d   : > { %962 = vmatpush3.bf16.msra.mxu1 %v367_v29 }
  0x1e   : > { %410 = vrot.lane.b32.xlu1 %v281_v5, %s1133_s16  ;;  %967 = vmatprep.subr.bf16.mxu1 %v1130_v0 }
  0x22   : > { %958 = vmatmul.mubr.msk.bf16.vlgmr.msra.gmra.mxu0 %vm300_vm1, %v281_v5  ;;  %526 = vrot.lane.b32.xlu1 %v281_v5, %s1134_s17 }
  0x23   : > { %975 = vmatprep.mubr.msk.bf16.mxu0 %vm1131_vm0, %v1130_v0 }
  0x26   : > { %642 = vrot.lane.b32.xlu1 %v283_v2, %s1135_s23 }
  0x2a   : > { %640 = vrot.lane.b32.xlu1 %v281_v5, %s1135_s23 }
  0x8c   : > { %v414_v32 = vpop.permute.xlu1 %413 }
  0x8d   : > { %v419_v34 = vsel %vm300_vm1, %v414_v32, 0 }
  0x90   : > { %v411_v36 = vpop.permute.xlu1 %410 }
  0x94   : > { %v527_v38 = vpop.permute.xlu1 %526 }
  0x98   : > { %v643_v40 = vpop.permute.xlu1 %642 }
  0x99   : > { %v648_v41 = vsel %vm300_vm1, %v643_v40, 0 }
  0x9c   : > { %v641_v42 = vpop.permute.xlu1 %640 }
  0xe2   : > { %v341_v14 = vpop.f32.mrf.mxu0 }
  0xe3   : > { %v347_v16 = vmul.f32 0.35355338, %v341_v14 }
  0xe4   : > { %v959_v17 = vpop.f32.mrf.mxu0 }
  0xe5   : > { %v348_v18 = vsel %vm1245_vm5, -1e+30, %v347_v16 }
  0xe6   : > { %v344_v19 = vpop.f32.mrf.mxu0  ;;  %v349_v20 = vsel %vm300_vm1, %v348_v18, -inf }
  0xe7   : > { %350 = vmax.xlane.f32.xlu0 %v349_v20 }
  0xe8   : > { %v960_v21 = vpop.f32.mrf.mxu0 }
 0x170   : > { %v351_v22 = vpop.xlane.xlu0 %350 }
 0x171   : > { %v352_v23 = vsub.f32 %v348_v18, %v351_v22 }
 0x173   : > { %v353_v24 = vmul.f32 1.442695, %v352_v23 }
 0x175   : > { %1052 = vpow2.f32 %v353_v24 }
 0x182   : > { %v1053_v25 = vpop.eup %1052 }
 0x183   : > { %v355_v26 = vsel %vm300_vm1, %v1053_v25, 0.0 }
 0x184   : > { %356 = vadd.xlane.f32.xlu0 %v355_v26 }
 0x19a   : > { %528 = vrot.lane.b32.xlu0 %v283_v2, %s1134_s17 }
 0x20d   : > { %v357_v30 = vpop.xlane.xlu0 %356 }
 0x20e   : > { %1054 = vrcp.f32 %v357_v30 }
 0x211   : > { %v529_v37 = vpop.permute.xlu0 %528 }
 0x212   : > { %v534_v39 = vsel %vm300_vm1, %v529_v37, 0 }
 0x21b   : > { %v1055_v31 = vpop.eup %1054 }
 0x21c   : > { %v359_v33 = vmul.f32 %v1055_v31, %v1053_v25 }
 0x21e   : > { %360 = vst.msk [vmem:[%s1272_s9] sm:$0xff] %vm300_vm1, %v359_v33  ;;  %v361_v35 = vpack.c.bf16 %v359_v33, %v359_v33 }
 0x220   : > { %964 = vmatmul.mubr.msk.bf16.vlgmr.msra.gmra.mxu1 %vm300_vm1, %v361_v35 }
 0x221   : > { %968 = vmatpush3.bf16.xpose.msra.mxu1 %v419_v34  ;;  %969 = vmatprep.mubr.msk.bf16.mxu1 %vm1131_vm0, %v1130_v0 }
 0x222   : > { %979 = vmatprep.subr.bf16.mxu1 %v1130_v0 }
 0x228   : > { %970 = vmatmul.mubr.msk.bf16.vlgmr.msra.gmra.mxu1 %vm300_vm1, %v411_v36 }
 0x229   : > { %980 = vmatpush3.bf16.xpose.msra.mxu1 %v534_v39  ;;  %981 = vmatprep.mubr.msk.bf16.mxu1 %vm1131_vm0, %v1130_v0 }
 0x22a   : > { %991 = vmatprep.subr.bf16.mxu1 %v1130_v0 }
 0x230   : > { %982 = vmatmul.mubr.msk.bf16.vlgmr.msra.gmra.mxu1 %vm300_vm1, %v527_v38 }
 0x231   : > { %992 = vmatpush3.bf16.xpose.msra.mxu1 %v648_v41  ;;  %993 = vmatprep.mubr.msk.bf16.mxu1 %vm1131_vm0, %v1130_v0 }
 0x238   : > { %994 = vmatmul.mubr.msk.bf16.vlgmr.msra.gmra.mxu1 %vm300_vm1, %v641_v42 }
 0x2e0   : > { %v1290_v43 = vpop.f32.mrf.mxu1 }
 0x2e2   : > { %v965_v44 = vpop.f32.mrf.mxu1 }
 0x2e4   : > { %v406_v45 = vpop.f32.mrf.mxu1 }
 0x2e6   : > { %v966_v46 = vpop.f32.mrf.mxu1 }
 0x2e8   : > { %v455_v47 = vpop.f32.mrf.mxu1 }
 0x2e9   : > { %v461_v48 = vmul.f32 0.35355338, %v455_v47 }
 0x2ea   : > { %v971_v49 = vpop.f32.mrf.mxu1 }
 0x2eb   : > { %v462_v50 = vsel %vm1245_vm5, -1e+30, %v461_v48 }
 0x2ec   : > { %v458_v51 = vpop.f32.mrf.mxu1  ;;  %v463_v52 = vsel %vm300_vm1, %v462_v50, -inf }
 0x2ed   : > { %464 = vmax.xlane.f32.xlu1 %v463_v52 }
 0x2ee   : > { %v972_v53 = vpop.f32.mrf.mxu1 }
 0x2f0   : > { %v570_v54 = vpop.f32.mrf.mxu1 }
 0x2f1   : > { %v576_v55 = vmul.f32 0.35355338, %v570_v54 }
 0x2f2   : > { %v983_v56 = vpop.f32.mrf.mxu1 }
 0x2f3   : > { %v577_v57 = vsel %vm1245_vm5, -1e+30, %v576_v55 }
 0x2f4   : > { %v573_v58 = vpop.f32.mrf.mxu1  ;;  %v578_v59 = vsel %vm300_vm1, %v577_v57, -inf }
 0x2f5   : > { %579 = vmax.xlane.f32.xlu0 %v578_v59 }
 0x2f6   : > { %v984_v60 = vpop.f32.mrf.mxu1 }
 0x2f8   : > { %v684_v61 = vpop.f32.mrf.mxu1 }
 0x2f9   : > { %v690_v62 = vmul.f32 0.35355338, %v684_v61 }
 0x2fa   : > { %v995_v63 = vpop.f32.mrf.mxu1 }
 0x2fb   : > { %v691_v1 = vsel %vm1245_vm5, -1e+30, %v690_v62 }
 0x2fc   : > { %v692_v2 = vsel %vm300_vm1, %v691_v1, -inf  ;;  %v687_v3 = vpop.f32.mrf.mxu1 }
 0x2fd   : > { %693 = vmax.xlane.f32.xlu1 %v692_v2 }
 0x2fe   : > { %v996_v4 = vpop.f32.mrf.mxu1 }
 0x376   : > { %v465_v5 = vpop.xlane.xlu1 %464 }
 0x377   : > { %v466_v6 = vsub.f32 %v462_v50, %v465_v5 }
 0x379   : > { %v467_v7 = vmul.f32 1.442695, %v466_v6 }
 0x37b   : > { %1056 = vpow2.f32 %v467_v7 }
 0x37e   : > { %v580_v8 = vpop.xlane.xlu0 %579 }
 0x37f   : > { %v581_v9 = vsub.f32 %v577_v57, %v580_v8 }
 0x381   : > { %v582_v10 = vmul.f32 1.442695, %v581_v9 }
 0x383   : > { %1058 = vpow2.f32 %v582_v10 }
 0x386   : > { %v694_v15 = vpop.xlane.xlu1 %693 }
 0x387   : > { %v695_v16 = vsub.f32 %v691_v1, %v694_v15 }
 0x388   : > { %v1057_v11 = vpop.eup %1056 }
 0x389   : > { %v469_v12 = vsel %vm300_vm1, %v1057_v11, 0.0  ;;  %v696_v17 = vmul.f32 1.442695, %v695_v16 }
 0x38a   : > { %470 = vadd.xlane.f32.xlu1 %v469_v12 }
 0x38b   : > { %1060 = vpow2.f32 %v696_v17 }
 0x390   : > { %v1059_v13 = vpop.eup %1058 }
 0x391   : > { %v584_v14 = vsel %vm300_vm1, %v1059_v13, 0.0 }
 0x392   : > { %585 = vadd.xlane.f32.xlu0 %v584_v14 }
 0x398   : > { %v1061_v18 = vpop.eup %1060 }
 0x399   : > { %v698_v19 = vsel %vm300_vm1, %v1061_v18, 0.0 }
 0x39b   : > { %592 = vrot.lane.b32.xlu1 %v1262_v28, %s1134_s17  ;;  %s1340_s17 = scalar_lea.sflag [#allocation3], %s257_s7 }
 0x3a8   : > { %478 = vrot.lane.b32.xlu0 %v1262_v28, %s1133_s16  ;;  %s1334_s16 = scalar_lea.hbm %s1392_s5, %s938_s12 }
 0x3bf   : > { %699 = vadd.xlane.f32.xlu1 %v698_v19 }
 0x3d0   : > { %706 = vrot.lane.b32.xlu1 %v1262_v28, %s1135_s23  ;;  %s1068_s23 = scalar_lea.vmem %s1336_s13, 512 }
 0x3d1   : > { %p1069_p11 = scmp.ne.s32.totalorder %s1336_s13, %s1068_s23  ;;  %p1076_p1 = scmp.lt.s32.totalorder %s1074_s26, %s1068_s23 }
 0x3d3   : > { %p1070_p12 = pnand %p1069_p11, %p1209_p5  ;;  %p1077_p2 = por %p1076_p1, %p1075_p0 }
 0x3d5   : > { %p1071_p13 = pneg %p1070_p12 }
 0x3d7   : > { %p1078_p3 = pnand %p1077_p2, %p1071_p13 }
 0x413   : > { %v471_v20 = vpop.xlane.xlu1 %470 }
 0x414   : > { %1062 = vrcp.f32 %v471_v20 }
 0x417   : > { %v593_v26 = vpop.permute.xlu1 %592 }
 0x418   : > { %v598_v29 = vsel %vm365_vm6, %v593_v26, 0 }
 0x41b   : > { %v586_v21 = vpop.xlane.xlu0 %585 }
 0x41c   : > { %1064 = vrcp.f32 %v586_v21 }
 0x41f   : > { %v479_v22 = vpop.permute.xlu0 %478 }
 0x420   : > { %v484_v23 = vsel %vm365_vm6, %v479_v22, 0 }
 0x421   : > { %v1063_v24 = vpop.eup %1062  ;;  %974 = vmatpush3.bf16.msra.mxu0 %v484_v23 }
 0x422   : > { %985 = vmatprep.subr.bf16.mxu0 %v1130_v0  ;;  %v473_v25 = vmul.f32 %v1063_v24, %v1057_v11 }
 0x424   : > { %925 = vst.msk [vmem:[%s1272_s9 + $0x8] sm:$0xff] %vm300_vm1, %v473_v25  ;;  %v476_v27 = vpack.c.bf16 %v473_v25, %v473_v25 }
 0x426   : > { %976 = vmatmul.mubr.msk.bf16.vlgmr.msra.gmra.mxu0 %vm300_vm1, %v476_v27 }
 0x427   : > { %986 = vmatpush3.bf16.msra.mxu0 %v598_v29  ;;  %987 = vmatprep.mubr.msk.bf16.mxu0 %vm1131_vm0, %v1130_v0 }
 0x428   : > { %997 = vmatprep.subr.bf16.mxu0 %v1130_v0 }
 0x429   : > { %v1065_v28 = vpop.eup %1064 }
 0x42a   : > { %v588_v30 = vmul.f32 %v1065_v28, %v1059_v13 }
 0x42c   : > { %928 = vst.msk [vmem:[%s1272_s9 + $0x10] sm:$0xff] %vm300_vm1, %v588_v30  ;;  %v591_v31 = vpack.c.bf16 %v588_v30, %v588_v30 }
 0x42e   : > { %988 = vmatmul.mubr.msk.bf16.vlgmr.msra.gmra.mxu0 %vm300_vm1, %v591_v31 }
 0x42f   : > { %999 = vmatprep.mubr.msk.bf16.mxu0 %vm1131_vm0, %v1130_v0 }
 0x448   : > { %v700_v32 = vpop.xlane.xlu1 %699 }
 0x449   : > { %1066 = vrcp.f32 %v700_v32 }
 0x44c   : > { %v707_v33 = vpop.permute.xlu1 %706 }
 0x44d   : > { %v712_v34 = vsel %vm365_vm6, %v707_v33, 0 }
 0x44e   : > { %998 = vmatpush3.bf16.msra.mxu0 %v712_v34 }
 0x456   : > { %v1067_v35 = vpop.eup %1066 }
 0x457   : > { %v702_v36 = vmul.f32 %v1067_v35, %v1061_v18 }
 0x459   : > { %931 = vst.msk [vmem:[%s1272_s9 + $0x18] sm:$0xff] %vm300_vm1, %v702_v36  ;;  %v705_v37 = vpack.c.bf16 %v702_v36, %v702_v36 }
 0x45b   : > { %1000 = vmatmul.mubr.msk.bf16.vlgmr.msra.gmra.mxu0 %vm300_vm1, %v705_v37 }
 0x4e6   : > { %v520_v38 = vpop.f32.mrf.mxu0 }
 0x4e7   : > { %755 = vrot.lane.b32.xlu0 %v520_v38, %s1136_s10 }
 0x4e8   : > { %v977_v0 = vpop.f32.mrf.mxu0 }
 0x4ea   : > { %v523_v39 = vpop.f32.mrf.mxu0 }
 0x4ec   : > { %v978_v40 = vpop.f32.mrf.mxu0 }
 0x4ee   : > { %v634_v41 = vpop.f32.mrf.mxu0 }
 0x4ef   : > { %759 = vrot.lane.b32.xlu1 %v634_v41, %s1137_s11 }
 0x4f0   : > { %v989_v42 = vpop.f32.mrf.mxu0 }
 0x4f2   : > { %v637_v44 = vpop.f32.mrf.mxu0 }
 0x4f4   : > { %v990_v45 = vpop.f32.mrf.mxu0 }
 0x4f5   : > { %1081 = shalt.err (!%p1078_p3)
}
 0x4f6   : > { %s1082_s30 = scalar_lea.hbm %s1334_s16, 512  ;;  %s1086_s9 = scalar_lea.hbm %s1392_s5, 1024 }
 0x4f7   : > { %p1083_p4 = scmp.ne.s32.totalorder %s1334_s16, %s1082_s30  ;;  %p1087_p9 = scmp.lt.s32.totalorder %s1334_s16, %s1392_s5 }
 0x4f8   : > { %p1088_p10 = scmp.lt.s32.totalorder %s1086_s9, %s1082_s30 }
 0x4f9   : > { %p1084_p7 = pnand %p1083_p4, %p1209_p5 }
 0x4fa   : > { %p1089_p11 = por %p1088_p10, %p1087_p9 }
 0x4fb   : > { %p1085_p8 = pneg %p1084_p7 }
 0x4fd   : > { %p1090_p12 = pnand %p1089_p11, %p1085_p8 }
 0x4ff   : > { %1093 = shalt.err (!%p1090_p12)
}
 0x500   : > { %s1139_s14 = smov 128   ;;  %s1140_s15 = smov 24   ;;  %vm767_vm7 = vcmask 130048   ;;  %vm769_vm8 = vcmask 195584   ;;  %vm771_vm9 = vcmask 261120  }
 0x501   : > { %1003 = dma.vmem_to_hbm [thread:$0]  (%p1209_p5), %s1336_s13, 512, %s1334_s16, %s1340_s17, %s1139_s14, %s1139_s14, %s1136_s10  }
 0x502   : > { %s278_s22 = scalar_lea.vmem %s1391_s4, %s1227_s6 }
 0x51b   : > { %v748_v46 = vpop.f32.mrf.mxu0 }
 0x51c   : > { %763 = vrot.lane.b32.xlu0 %v748_v46, %s1140_s15 }
 0x51d   : > { %v1001_v47 = vpop.f32.mrf.mxu0 }
 0x51f   : > { %v751_v48 = vpop.f32.mrf.mxu0 }
 0x521   : > { %v1002_v49 = vpop.f32.mrf.mxu0 }
 0x559   : > { %v756_v50 = vpop.permute.xlu0 %755 }
 0x55a   : > { %v766_v52 = vsel %vm300_vm1, %v1290_v43, %v756_v50 }
 0x561   : > { %v760_v51 = vpop.permute.xlu1 %759 }
 0x562   : > { %v768_v53 = vsel %vm767_vm7, %v766_v52, %v760_v51 }
 0x58e   : > { %v764_v54 = vpop.permute.xlu0 %763 }
 0x58f   : > { %v770_v55 = vsel %vm769_vm8, %v768_v53, %v764_v54 }
 0x590   : > { %772 = vst.msk [vmem:[%s278_s22] sm:$0xff] %vm771_vm9, %v770_v55 }
 0x591 PF: > { %p1009_p5 = scmp.ge.s32.totalorder %s1128_s21, 2  ;;  %s816_s10 = sand.u32 1, %s1116_s18  }
 0x592   : > { %s817_s13 = scalar_lea.sflag [#allocation3], %s816_s10 }
 0x593   : > { %p1006_p13 = pnand %p1009_p5, %p1213_p6 }
 0x595   : > { %p1007_p0 = pneg %p1006_p13 }
 0x597   : > { %1111 = dma.done.wait (%p1007_p0), %s817_s13, 512  }
 0x598   : > { %1113 = vsyncadd (%p1007_p0), %s817_s13, 4294966784  ;;  %p16_p1 = scmp.ge.s32.totalorder %s1196_s24, 4   ;;  %s1397_s18 = smov %s1120_s19 }
 0x599   : > { %s1398_s19 = smov %s1124_s20  ;;  %s1399_s20 = smov %s1207_s27 }
 0x59a   : > { %s1400_s21 = smov %s1196_s24  ;;  %18 = sbr.rel (!%p16_p1) target bundleno = 3 (0x3), region = 95 }
 0x59f   :  { %822 = vsyncpa [#allocation3], 1 }
 0x5a0   :  { %824 = vsyncpa [#allocation3 + $0x1], 1 }

// kernel: transformer_forward.49
= control target key start
LH: loop header
LB: loop body
LE: loop exit
PB: predicated region body
PF: predicated region fallthrough
CT: control target
= control target key end

     0   :  { %7 = vsyncpa [#allocation5], 0  ;;  %s715_s0 = inlined_call_operand.vmem [shape: f32[16,32], index: 0, kind: input, shape index: {}]   ;;  %s716_s1 = inlined_call_operand.vmem [shape: bf16[32,16], index: 1, kind: input, shape index: {}]   ;;  %s717_s2 = inlined_call_operand.hbm [shape: f32[16,16], index: 2, kind: output, shape index: {}]  }
   0x1   :  { %9 = vsyncpa [#allocation5 + $0x1], 0  ;;  %s635_s9 = smov 0   ;;  %s637_s10 = smov 0  }
   0x2   :  { %s639_s11 = smov 0  }
   0x3 LB: > { %s465_s12 = sadd.s32 4294967295, %s609_s11   ;;  %s466_s13 = sadd.s32 4294967294, %s609_s11   ;;  %s609_s11 = sphi %s639_s11, %s15_s11   ;;  %s605_s10 = sphi %s637_s10, %s720_s10   ;;  %s601_s9 = sphi %s635_s9, %s719_s9  }
   0x4   : > { %s30_s14 = sadd.s32 1, %s605_s10  ;;  %p470_p0 = scmp.ge.s32.totalorder %s609_s11, 1 }
   0x5   : > { %p32_p1 = scmp.ge.s32.totalorder %s30_s14, 2  ;;  %p148_p2 = scmp.lt.s32.totalorder %s609_s11, 3 }
   0x7   : > { %s722_s14 = smov (%p32_p1, %s30_s14), 0  ;;  %p149_p3 = pnand %p470_p0, %p148_p2 }
   0x8   : > { %p187_p4 = scmp.eq.s32.totalorder (!%p149_p3), %s601_s9, 0 }
   0x9   : > { %152 = sbr.rel (%p149_p3) target bundleno = 829 (0x33d), region = 28 }
   0xe   : > { %192 = sbr.rel (!%p187_p4) target bundleno = 19 (0x13), region = 32  ;;  %vm193_vm0 = vcmask (%p187_p4), 7168   ;;  %v611_v0 = vmov (%p187_p4), -inf   ;;  %v612_v1 = vmov (%p187_p4), 0.0  }
   0xf   : > { %194 = vst.msk [vmem:[#allocation2] sm:$0xff] (%p187_p4), %vm193_vm0, %v611_v0  ;;  %195 = vst.msk [vmem:[#allocation2 + $0x8] sm:$0xff] (%p187_p4), %vm193_vm0, %v611_v0 }
  0x10   : > { %196 = vst.msk [vmem:[#allocation3] sm:$0xff] (%p187_p4), %vm193_vm0, %v612_v1  ;;  %197 = vst.msk [vmem:[#allocation3 + $0x8] sm:$0xff] (%p187_p4), %vm193_vm0, %v612_v1 }
  0x13 PF: > { %v537_v2 = vld [vmem:[%s716_s1 + $0x8] sm:$0xff]   ;;  %v613_v3 = vmov 0.0   ;;  %v538_v4 = vld [vmem:[%s716_s1] sm:$0xff]   ;;  %vm614_vm1 = vmmov 0   ;;  %vm217_vm2 = vcmask 261120   ;;  %p475_p5 = scmp.ne.s32.totalorder %s601_s9, 0 }
  0x14   : > { %485 = vmatprep.subr.bf16.mxu0 %v613_v3  ;;  %489 = vmatprep.mubr.msk.bf16.mxu0 %vm614_vm1, %v613_v3  ;;  %v198_v5 = vld [vmem:[%s715_s0] sm:$0xff]  ;;  %v199_v6 = vld [vmem:[%s715_s0 + $0x8] sm:$0xff] }
  0x15   : > { %486 = vmatpush3.bf16.msra.mxu0 %v537_v2  ;;  %v200_v7 = vpack.c.bf16 %v199_v6, %v198_v5 }
  0x16   : > { %487 = vmatprep.subr.bf16.mxu0 %v613_v3 }
  0x19   : > { %488 = vmatpush3.bf16.msra.mxu0 %v538_v4 }
  0x1c   : > { %490 = vmatmul.mubr.msk.bf16.vlgmr.msra.gmra.mxu0 %vm217_vm2, %v200_v7 }
  0xdc   : > { %v670_v8 = vpop.f32.mrf.mxu0 }
  0xde   : > { %v491_v9 = vpop.f32.mrf.mxu0  ;;  %264 = sbr.rel (%p475_p5) target bundleno = 657 (0x291), region = 36 }
  0xe0   : > { %v672_v10 = vpop.f32.mrf.mxu0 }
  0xe2   : > { %v492_v11 = vpop.f32.mrf.mxu0 }
  0xe3   : > { %vm267_vm3 = vcmask 130048   ;;  %v615_v14 = vmov 0   ;;  %v265_v15 = vld [vmem:[#allocation2] sm:$0xff]  ;;  %vm310_vm4 = vcmask 7168   ;;  %v266_v18 = vld [vmem:[#allocation2 + $0x8] sm:$0xff]  ;;  %v276_v36 = vld [vmem:[#allocation3] sm:$0xff] }
  0xe4   : > { %v268_v12 = vsel %vm267_vm3, %v670_v8, -inf  ;;  %v271_v13 = vsel %vm267_vm3, %v672_v10, -inf  ;;  %539 = vset.pattern.permute.xlu1 %v615_v14  ;;  %540 = vset.pattern.permute.xlu0 %v615_v14  ;;  %v277_v40 = vld [vmem:[#allocation3 + $0x8] sm:$0xff] }
  0xe5   : > { %269 = vmax.xlane.f32.xlu0 %v268_v12 }
  0xe9   : > { %272 = vmax.xlane.f32.xlu0 %v271_v13 }
 0x16e   : > { %v270_v16 = vpop.xlane.xlu0 %269 }
 0x16f   : > { %v274_v17 = vmax.f32 %v265_v15, %v270_v16 }
 0x171   : > { %v278_v19 = vsub.f32 %v265_v15, %v274_v17  ;;  %313 = vst.msk [vmem:[#allocation2] sm:$0xff] %vm310_vm4, %v274_v17  ;;  %288 = vperm.xlu1 %539, %v274_v17  }
 0x172   : > { %v273_v20 = vpop.xlane.xlu0 %272 }
 0x173   : > { %v275_v21 = vmax.f32 %v266_v18, %v273_v20  ;;  %v280_v33 = vmul.f32 1.442695, %v278_v19 }
 0x175   : > { %v279_v22 = vsub.f32 %v266_v18, %v275_v21  ;;  %314 = vst.msk [vmem:[#allocation2 + $0x8] sm:$0xff] %vm310_vm4, %v275_v21  ;;  %293 = vperm.xlu1 %539, %v275_v21  }
 0x177   : > { %v282_v34 = vmul.f32 1.442695, %v279_v22 }
 0x1ec   : > { %v289_v23 = vpop.permute.xlu1 %288 }
 0x1ed   : > { %v296_v24 = vsub.f32 %v670_v8, %v289_v23 }
 0x1ef   : > { %v298_v25 = vmul.f32 1.442695, %v296_v24 }
 0x1f0   : > { %v294_v26 = vpop.permute.xlu1 %293 }
 0x1f1   : > { %541 = vpow2.f32 %v298_v25  ;;  %v297_v27 = vsub.f32 %v672_v10, %v294_v26 }
 0x1f3   : > { %v300_v28 = vmul.f32 1.442695, %v297_v27 }
 0x1f5   : > { %543 = vpow2.f32 %v300_v28 }
 0x1f6   : > { %545 = vpow2.f32 %v280_v33 }
 0x1f7   : > { %547 = vpow2.f32 %v282_v34 }
 0x1fe   : > { %v542_v29 = vpop.eup %541 }
 0x1ff   : > { %v302_v30 = vsel %vm267_vm3, %v542_v29, 0.0 }
 0x200   : > { %303 = vadd.xlane.f32.xlu0 %v302_v30 }
 0x202   : > { %v544_v31 = vpop.eup %543 }
 0x203   : > { %v305_v32 = vsel %vm267_vm3, %v544_v31, 0.0  ;;  %v546_v35 = vpop.eup %545 }
 0x204   : > { %306 = vadd.xlane.f32.xlu1 %v305_v32  ;;  %v284_v37 = vmul.f32 %v546_v35, %v276_v36  ;;  %v548_v38 = vpop.eup %547 }
 0x205   : > { %v285_v42 = vmul.f32 %v548_v38, %v277_v40 }
 0x289   : > { %v304_v39 = vpop.xlane.xlu0 %303 }
 0x28a   : > { %v308_v41 = vadd.f32 %v304_v39, %v284_v37 }
 0x28c   : > { %311 = vst.msk [vmem:[#allocation3] sm:$0xff] %vm310_vm4, %v308_v41 }
 0x28d   : > { %v307_v43 = vpop.xlane.xlu1 %306 }
 0x28e   : > { %v309_v44 = vadd.f32 %v307_v43, %v285_v42 }
 0x290   : > { %312 = vst.msk [vmem:[#allocation3 + $0x8] sm:$0xff] %vm310_vm4, %v309_v44 }
 0x291 PF: > { %p476_p6 = scmp.ne.s32.totalorder %s601_s9, 1 }
 0x293   : > { %318 = sbr.rel (%p476_p6) target bundleno = 815 (0x32f), region = 40 }
 0x298   : > { %v337_v45 = vld [vmem:[#allocation3] sm:$0xff]  ;;  %v319_v46 = vld [vmem:[#allocation2] sm:$0xff]  ;;  %v616_v47 = vmov 0   ;;  %v338_v48 = vld [vmem:[#allocation3 + $0x8] sm:$0xff]  ;;  %vm353_vm5 = vcmask 130048  }
 0x299   : > { %550 = vset.pattern.permute.xlu1 %v616_v47  ;;  %549 = vset.pattern.permute.xlu0 %v616_v47  ;;  %v320_v49 = vld [vmem:[#allocation2 + $0x8] sm:$0xff] }
 0x29a   : > { %341 = vperm.xlu1 %550, %v337_v45   ;;  %323 = vperm.xlu0 %549, %v319_v46  }
 0x29e   : > { %346 = vperm.xlu1 %550, %v338_v48   ;;  %328 = vperm.xlu0 %549, %v320_v49  }
 0x315   : > { %v342_v50 = vpop.permute.xlu1 %341  ;;  %v324_v51 = vpop.permute.xlu0 %323 }
 0x316   : > { %v331_v52 = vsub.f32 %v670_v8, %v324_v51  ;;  %551 = vrcp.f32 %v342_v50 }
 0x318   : > { %v333_v53 = vmul.f32 1.442695, %v331_v52 }
 0x319   : > { %v329_v54 = vpop.permute.xlu0 %328  ;;  %v347_v55 = vpop.permute.xlu1 %346 }
 0x31a   : > { %553 = vpow2.f32 %v333_v53  ;;  %v332_v56 = vsub.f32 %v672_v10, %v329_v54 }
 0x31b   : > { %555 = vrcp.f32 %v347_v55 }
 0x31c   : > { %v335_v57 = vmul.f32 1.442695, %v332_v56 }
 0x31e   : > { %557 = vpow2.f32 %v335_v57 }
 0x323   : > { %v552_v58 = vpop.eup %551 }
 0x327   : > { %v554_v59 = vpop.eup %553 }
 0x328   : > { %v350_v60 = vmul.f32 %v554_v59, %v552_v58  ;;  %v556_v61 = vpop.eup %555 }
 0x32a   : > { %354 = vst.msk [vmem:[#allocation4] sm:$0xff] %vm353_vm5, %v350_v60 }
 0x32b   : > { %v558_v62 = vpop.eup %557 }
 0x32c   : > { %v352_v63 = vmul.f32 %v558_v62, %v556_v61 }
 0x32e   : > { %355 = vst.msk [vmem:[#allocation4 + $0x8] sm:$0xff] %vm353_vm5, %v352_v63 }
 0x32f PF: > { %p692_p7 = scmp.eq.s32.totalorder %s465_s12, 1  ;;  %s617_s24 = smov [#allocation4]  }
 0x330   : > { %s372_s25 = sshll.u32 %s617_s24, 4  ;;  %s373_s25 = int_to_ptr.vmem [resolvable:$true] %s372_s25 }
 0x331   : > { %s559_s26 = scalar_lea.vmem %s373_s25, 256  ;;  %s565_s27 = scalar_lea.vmem %s373_s25, 512 }
 0x332   : > { %p560_p8 = scmp.ne.s32.totalorder %s373_s25, %s559_s26  ;;  %p566_p11 = scmp.lt.s32.totalorder %s373_s25, %s373_s25 }
 0x333   : > { %p567_p12 = scmp.lt.s32.totalorder %s565_s27, %s559_s26 }
 0x334   : > { %p561_p9 = pnand %p560_p8, %p692_p7 }
 0x335   : > { %p568_p13 = por %p567_p12, %p566_p11 }
 0x336   : > { %p562_p10 = pneg %p561_p9 }
 0x338   : > { %p569_p0 = pnand %p568_p13, %p562_p10 }
 0x33a   : > { %572 = shalt.err (!%p569_p0)
}
 0x33b   : > { %s618_s28 = smov 128   ;;  %s619_s29 = smov 8  }
 0x33c   : > { %494 = dma.vmem_to_hbm [thread:$0]  (%p692_p7), %s373_s25, 256, %s717_s2, [#allocation5], %s618_s28, %s618_s28, %s619_s29  }
 0x33d PF: > { %p502_p1 = scmp.ge.s32.totalorder %s609_s11, 2  ;;  %p503_p2 = scmp.eq.s32.totalorder %s466_s13, 1 }
 0x33f   : > { %p498_p3 = pnand %p503_p2, %p502_p1 }
 0x341   : > { %p499_p4 = pneg %p498_p3 }
 0x343   : > { %596 = dma.done.wait (%p499_p4), [#allocation5], 256  }
 0x344   : > { %598 = vsyncadd (%p499_p4), [#allocation5], 4294967040  ;;  %s15_s11 = sadd.s32 1, %s609_s11   ;;  %s719_s9 = smov %s605_s10 }
 0x345   : > { %p12_p5 = scmp.ge.s32.totalorder %s15_s11, 4   ;;  %s720_s10 = smov %s722_s14 }
 0x347   :  { %14 = sbr.rel (!%p12_p5) target bundleno = 3 (0x3), region = 78 }
 0x34c   :  { %393 = vsyncpa [#allocation5], 1 }
 0x34d   :  { %395 = vsyncpa [#allocation5 + $0x1], 1 }

</bundles_post_ra>
